<compile_context>
chip_gen: v5e
topology: v5e:2x2
jax: 0.10.0
libtpu: 0.0.40
codegen_flags: <defaults>
</compile_context>

<pallas_src>
import math
import functools

import jax
import jax.numpy as jnp
from jax import lax
from jax.experimental import pallas as pl
from jax.experimental.pallas import tpu as pltpu

RMS_EPS = 1e-5


# ------------------------------ Pallas kernel -------------------------------
def _mamba_cross_kernel(x1_ref, x2_ref, g1_ref, g2_ref, win1_ref, win2_ref,
                        c1w_ref, c1b_ref, c2w_ref, c2b_ref, wbc_ref, bdt_ref,
                        a2_ref, a2b_ref, wout_ref, out_ref,
                        *, L, Dm, Di, N, K):
    f32 = jnp.float32
    x1 = x1_ref[0].astype(f32)                       # (L, Dm)
    x2 = x2_ref[0].astype(f32)

    # --- RMSNorm (rsqrt goes to the EUP slot) ---
    def rmsnorm(x, g):
        return x * lax.rsqrt(jnp.mean(x * x, axis=-1, keepdims=True) + RMS_EPS) * g

    x1n = rmsnorm(x1, g1_ref[...])
    x2n = rmsnorm(x2, g2_ref[...])

    # --- input projections (bias=False) ---
    p1 = jnp.dot(x1n, win1_ref[...], preferred_element_type=f32)   # (L, 3*Di)
    xin1 = p1[:, :Di]
    t1 = p1[:, Di:2 * Di]
    z1 = p1[:, 2 * Di:3 * Di]
    xin2 = jnp.dot(x2n, win2_ref[...], preferred_element_type=f32)  # (L, Di)

    # --- depthwise causal conv1d (kernel K, padding K-1, cropped to L) ---
    def causal_conv(xp, w, b):                       # w: (K, Di), b: (1, Di)
        acc = jnp.zeros((L, Di), f32)
        for k in range(K):
            shift = K - 1 - k
            if shift == 0:
                xs = xp
            else:
                xs = jnp.concatenate(
                    [jnp.zeros((shift, Di), f32), xp[:L - shift, :]], axis=0)
            acc = acc + w[k:k + 1, :] * xs
        return acc + b

    x1c = causal_conv(xin1, c1w_ref[...], c1b_ref[...])   # (L, Di)
    x2c = causal_conv(xin2, c2w_ref[...], c2b_ref[...])   # (L, Di)

    # --- fused x2_proj + dt_proj2: one matmul gives [delta_pre | B | C] ---
    proj = jnp.dot(x2c, wbc_ref[...], preferred_element_type=f32)  # (L, Di+2N)
    delta = jax.nn.softplus(proj[:, :Di] + bdt_ref[...])           # (L, Di)
    Bm = proj[:, Di:Di + N]                                        # (L, N)
    Cm = proj[:, Di + N:Di + 2 * N]                                # (L, N)

    a2 = a2_ref[...]                  # (N, Di) = (-exp(A2_log)).T, Di on lanes
    a2b = a2b_ref[...]
    du = delta * x1c                  # (L, Di)

    # Per-state-channel precompute; everything stays lane-dense in vregs.
    dA_f = [jnp.exp(delta * a2[n:n + 1, :]) for n in range(N)]     # (L, Di) each
    dA_b = [jnp.exp(delta * a2b[n:n + 1, :]) for n in range(N)]
    B_n = [Bm[:, n:n + 1] for n in range(N)]                       # (L, 1) each
    C_n = [Cm[:, n:n + 1] for n in range(N)]
    bx_f = [B_n[n] * du for n in range(N)]                         # (L, Di) each

    h_f = [jnp.zeros((1, Di), f32) for _ in range(N)]
    h_b = [jnp.zeros((1, Di), f32) for _ in range(N)]
    y_f = [None] * L
    y_b = [None] * L

    # Fully unrolled value-carrying selective scans (fwd + flipped-input bwd).
    # The backward scan consumes flipped x1 but un-flipped delta/B/C, and its
    # output is written back flipped — exactly the PyTorch forward.
    for t in range(L):
        tr = L - 1 - t
        du_b = delta[t:t + 1, :] * x1c[tr:tr + 1, :]               # (1, Di)
        acc_f = jnp.zeros((1, Di), f32)
        acc_b = jnp.zeros((1, Di), f32)
        for n in range(N):
            h_f[n] = dA_f[n][t:t + 1, :] * h_f[n] + bx_f[n][t:t + 1, :]
            h_b[n] = dA_b[n][t:t + 1, :] * h_b[n] + B_n[n][t:t + 1, :] * du_b
            acc_f = acc_f + C_n[n][t:t + 1, :] * h_f[n]
            acc_b = acc_b + C_n[n][t:t + 1, :] * h_b[n]
        y_f[t] = acc_f
        y_b[tr] = acc_b

    y_scan = jnp.concatenate(y_f, axis=0) + jnp.concatenate(y_b, axis=0)  # (L, Di)

    # gate and output projection
    y1 = (y_scan + t1) * jax.nn.silu(z1)
    out = jnp.dot(y1, wout_ref[...], preferred_element_type=f32)   # (L, Dm)
    out_ref[0] = out.astype(out_ref.dtype)


# --------------------------------- wrapper -----------------------------------
def residual_cross_block_forward(x1, x2, p, *, d_state, dt_rank, d_conv):
    Bsz, L, Dm = x1.shape
    Di = p['Win2'].shape[0]
    N, R, K = d_state, dt_rank, d_conv

    # Host-side parameter-only prep (done once):
    #  - fuse x2_proj[:R] with dt_proj2 into one (Di, Di+2N) weight
    #  - A = -exp(A_log), transposed so d_inner sits on the lane axis
    Wxp, Wdt = p['Wxp'], p['Wdt']
    w_comb = jnp.concatenate([Wxp[:R, :].T @ Wdt.T, Wxp[R:, :].T], axis=1)
    a2_t = (-jnp.exp(p['A2_log'])).T                 # (N, Di)
    a2b_t = (-jnp.exp(p['A2b_log'])).T

    kernel = functools.partial(_mamba_cross_kernel, L=L, Dm=Dm, Di=Di, N=N, K=K)
    rep = lambda s: pl.BlockSpec(s, lambda b: (0, 0))
    xspec = pl.BlockSpec((1, L, Dm), lambda b: (b, 0, 0))

    return pl.pallas_call(
        kernel,
        out_shape=jax.ShapeDtypeStruct((Bsz, L, Dm), jnp.float32),
        grid_spec=pltpu.PrefetchScalarGridSpec(
            num_scalar_prefetch=0,
            grid=(Bsz,),
            in_specs=[
                xspec, xspec,                         # x1, x2
                rep((1, Dm)), rep((1, Dm)),           # rms weights
                rep((Dm, 3 * Di)), rep((Dm, Di)),     # in_proj1.T, in_proj2.T
                rep((K, Di)), rep((1, Di)),           # conv1 w/b
                rep((K, Di)), rep((1, Di)),           # conv2 w/b
                rep((Di, Di + 2 * N)), rep((1, Di)),  # fused proj, dt bias
                rep((N, Di)), rep((N, Di)),           # -exp(A2_log).T, -exp(A2b_log).T
                rep((Di, Dm)),                        # out_proj.T
            ],
            out_specs=pl.BlockSpec((1, L, Dm), lambda b: (b, 0, 0)),
        ),
        compiler_params=pltpu.CompilerParams(
            dimension_semantics=("parallel",)),
    )(x1, x2,
      p['rms1'].reshape(1, Dm), p['rms2'].reshape(1, Dm),
      p['Win1'].T, p['Win2'].T,
      p['conv1_w'].T, p['conv1_b'].reshape(1, Di),
      p['conv2_w'].T, p['conv2_b'].reshape(1, Di),
      w_comb, p['bdt'].reshape(1, Di),
      a2_t, a2b_t, p['Wout'].T)


# ----------------------------- pure-JAX reference ----------------------------
def reference_forward(x1, x2, p, *, d_state, dt_rank, d_conv):
    N, R, K = d_state, dt_rank, d_conv

    def rmsnorm(x, g):
        return x * lax.rsqrt(jnp.mean(x * x, -1, keepdims=True) + RMS_EPS) * g

    x1n = rmsnorm(x1, p['rms1'])
    x2n = rmsnorm(x2, p['rms2'])
    Di = p['Win2'].shape[0]
    p1 = x1n @ p['Win1'].T
    xi1, t1, z1 = p1[..., :Di], p1[..., Di:2 * Di], p1[..., 2 * Di:]
    xi2 = x2n @ p['Win2'].T

    def conv(xp, cw, cb):                            # cw (Di, K), cb (Di,)
        Bsz, L, D = xp.shape
        pad = jnp.concatenate([jnp.zeros((Bsz, K - 1, D), xp.dtype), xp], axis=1)
        out = jnp.zeros_like(xp)
        for k in range(K):
            out = out + cw[:, k] * pad[:, k:k + L, :]
        return out + cb

    x1c = conv(xi1, p['conv1_w'], p['conv1_b'])
    x2c = conv(xi2, p['conv2_w'], p['conv2_b'])

    proj = x2c @ p['Wxp'].T
    delta = jax.nn.softplus(proj[..., :R] @ p['Wdt'].T + p['bdt'])
    Bm, Cm = proj[..., R:R + N], proj[..., R + N:R + 2 * N]
    A2 = -jnp.exp(p['A2_log'])                       # (Di, N)
    A2b = -jnp.exp(p['A2b_log'])

    def scan_seq(u, dlt, Bseq, Cseq, A):             # u, dlt (L, Di); B,C (L, N)
        L_ = u.shape[0]
        h = jnp.zeros((u.shape[1], A.shape[1]), jnp.float32)
        ys = []
        for t in range(L_):
            dA = jnp.exp(dlt[t][:, None] * A)
            h = dA * h + (dlt[t] * u[t])[:, None] * Bseq[t][None, :]
            ys.append(h @ Cseq[t])
        return jnp.stack(ys, axis=0)

    outs = []
    for b in range(x1.shape[0]):
        yf = scan_seq(x1c[b], delta[b], Bm[b], Cm[b], A2)
        yb = scan_seq(x1c[b, ::-1], delta[b], Bm[b], Cm[b], A2b)[::-1]
        outs.append(yf + yb)
    y = jnp.stack(outs, axis=0)
    y1 = (y + t1) * jax.nn.silu(z1)
    return y1 @ p['Wout'].T


# ----------------------------------- main -------------------------------------
if __name__ == "__main__":
    Bsz, L = 2, 8
    Dm, Di, N, K = 32, 64, 4, 4          # d_model, d_inner (expand=2), d_state, d_conv
    R = max(1, math.ceil(Dm / 16))       # dt_rank = 2
    dt_min, dt_max, dt_floor, dt_scale = 1e-3, 1e-1, 1e-4, 1.0

    key = jax.random.PRNGKey(0)
    ks = jax.random.split(key, 14)
    f32 = jnp.float32

    p = {}
    p['rms1'] = 1.0 + 0.1 * jax.random.normal(ks[0], (Dm,), f32)
    p['rms2'] = 1.0 + 0.1 * jax.random.normal(ks[1], (Dm,), f32)
    p['Win1'] = jax.random.normal(ks[2], (3 * Di, Dm), f32) / math.sqrt(Dm)
    p['Win2'] = jax.random.normal(ks[3], (Di, Dm), f32) / math.sqrt(Dm)
    p['conv1_w'] = jax.random.uniform(ks[4], (Di, K), f32, -1.0, 1.0) / math.sqrt(K)
    p['conv1_b'] = 0.1 * jax.random.normal(ks[5], (Di,), f32)
    p['conv2_w'] = jax.random.uniform(ks[6], (Di, K), f32, -1.0, 1.0) / math.sqrt(K)
    p['conv2_b'] = 0.1 * jax.random.normal(ks[7], (Di,), f32)
    p['Wxp'] = jax.random.normal(ks[8], (R + 2 * N, Di), f32) / math.sqrt(Di)
    dt_init_std = R ** (-0.5) * dt_scale
    p['Wdt'] = jax.random.uniform(ks[9], (Di, R), f32, -dt_init_std, dt_init_std)
    dt = jnp.exp(jax.random.uniform(ks[10], (Di,), f32)
                 * (math.log(dt_max) - math.log(dt_min)) + math.log(dt_min))
    dt = jnp.maximum(dt, dt_floor)
    p['bdt'] = dt + jnp.log(-jnp.expm1(-dt))         # inverse-softplus bias
    A2 = jnp.tile(jnp.arange(1, N + 1, dtype=f32), (Di, 1))
    p['A2_log'] = jnp.log(A2)
    p['A2b_log'] = jnp.log(A2)
    p['Wout'] = jax.random.normal(ks[11], (Dm, Di), f32) / math.sqrt(Di)

    x1 = jax.random.normal(ks[12], (Bsz, L, Dm), f32)
    x2 = jax.random.normal(ks[13], (Bsz, L, Dm), f32)

    out = residual_cross_block_forward(x1, x2, p, d_state=N, dt_rank=R, d_conv=K)
    out = jax.block_until_ready(out)

    ref = reference_forward(x1, x2, p, d_state=N, dt_rank=R, d_conv=K)
    ref = jax.block_until_ready(ref)

    assert out.shape == (Bsz, L, Dm)
    max_diff = float(jnp.max(jnp.abs(out - ref)))
    assert jnp.allclose(out, ref, rtol=1e-4, atol=1e-4), max_diff
    print("KERNEL_OK")
</pallas_src>

<mosaic_0001>
module attributes {stable_mosaic.version = 11 : i64} {
  func.func @_mamba_cross_kernel(%arg0: i32, %arg1: memref<1x8x32xf32, #tpu.memory_space<vmem>>, %arg2: memref<1x8x32xf32, #tpu.memory_space<vmem>>, %arg3: memref<1x32xf32, #tpu.memory_space<vmem>>, %arg4: memref<1x32xf32, #tpu.memory_space<vmem>>, %arg5: memref<32x192xf32, #tpu.memory_space<vmem>>, %arg6: memref<32x64xf32, #tpu.memory_space<vmem>>, %arg7: memref<4x64xf32, #tpu.memory_space<vmem>>, %arg8: memref<1x64xf32, #tpu.memory_space<vmem>>, %arg9: memref<4x64xf32, #tpu.memory_space<vmem>>, %arg10: memref<1x64xf32, #tpu.memory_space<vmem>>, %arg11: memref<64x72xf32, #tpu.memory_space<vmem>>, %arg12: memref<1x64xf32, #tpu.memory_space<vmem>>, %arg13: memref<4x64xf32, #tpu.memory_space<vmem>>, %arg14: memref<4x64xf32, #tpu.memory_space<vmem>>, %arg15: memref<64x32xf32, #tpu.memory_space<vmem>>, %arg16: memref<1x8x32xf32, #tpu.memory_space<vmem>>) attributes {dimension_semantics = [#tpu.dimension_semantics<parallel>], iteration_bounds = array<i64: 2>, scalar_prefetch = 0 : i64, scratch_operands = 0 : i64, tpu.core_type = #tpu.core_type<tc>, window_params = [{transform_indices = @transform_0, window_bounds = array<i64: 1, 8, 32>}, {transform_indices = @transform_1, window_bounds = array<i64: 1, 8, 32>}, {pipeline_mode = #tpu.pipeline_mode<synchronous>, transform_indices = @transform_2, window_bounds = array<i64: 1, 32>}, {pipeline_mode = #tpu.pipeline_mode<synchronous>, transform_indices = @transform_3, window_bounds = array<i64: 1, 32>}, {pipeline_mode = #tpu.pipeline_mode<synchronous>, transform_indices = @transform_4, window_bounds = array<i64: 32, 192>}, {pipeline_mode = #tpu.pipeline_mode<synchronous>, transform_indices = @transform_5, window_bounds = array<i64: 32, 64>}, {pipeline_mode = #tpu.pipeline_mode<synchronous>, transform_indices = @transform_6, window_bounds = array<i64: 4, 64>}, {pipeline_mode = #tpu.pipeline_mode<synchronous>, transform_indices = @transform_7, window_bounds = array<i64: 1, 64>}, {pipeline_mode = #tpu.pipeline_mode<synchronous>, transform_indices = @transform_8, window_bounds = array<i64: 4, 64>}, {pipeline_mode = #tpu.pipeline_mode<synchronous>, transform_indices = @transform_9, window_bounds = array<i64: 1, 64>}, {pipeline_mode = #tpu.pipeline_mode<synchronous>, transform_indices = @transform_10, window_bounds = array<i64: 64, 72>}, {pipeline_mode = #tpu.pipeline_mode<synchronous>, transform_indices = @transform_11, window_bounds = array<i64: 1, 64>}, {pipeline_mode = #tpu.pipeline_mode<synchronous>, transform_indices = @transform_12, window_bounds = array<i64: 4, 64>}, {pipeline_mode = #tpu.pipeline_mode<synchronous>, transform_indices = @transform_13, window_bounds = array<i64: 4, 64>}, {pipeline_mode = #tpu.pipeline_mode<synchronous>, transform_indices = @transform_14, window_bounds = array<i64: 64, 32>}, {transform_indices = @transform_15, window_bounds = array<i64: 1, 8, 32>}]} {
    %c0 = arith.constant 0 : index
    %c0_0 = arith.constant 0 : index
    %c0_1 = arith.constant 0 : index
    %0 = vector.load %arg1[%c0, %c0_0, %c0_1] : memref<1x8x32xf32, #tpu.memory_space<vmem>>, vector<1x8x32xf32>
    %1 = vector.shape_cast %0 : vector<1x8x32xf32> to vector<8x32xf32>
    %c0_2 = arith.constant 0 : index
    %c0_3 = arith.constant 0 : index
    %c0_4 = arith.constant 0 : index
    %2 = vector.load %arg2[%c0_2, %c0_3, %c0_4] : memref<1x8x32xf32, #tpu.memory_space<vmem>>, vector<1x8x32xf32>
    %3 = vector.shape_cast %2 : vector<1x8x32xf32> to vector<8x32xf32>
    %c0_5 = arith.constant 0 : index
    %c0_6 = arith.constant 0 : index
    %4 = vector.load %arg3[%c0_5, %c0_6] : memref<1x32xf32, #tpu.memory_space<vmem>>, vector<1x32xf32>
    %5 = arith.mulf %1, %1 : vector<8x32xf32>
    %cst = arith.constant dense<0.000000e+00> : vector<8xf32>
    %6 = vector.multi_reduction <add>, %5, %cst [1] : vector<8x32xf32> to vector<8xf32>
    %7 = vector.shape_cast %6 : vector<8xf32> to vector<8x1xf32>
    %cst_7 = arith.constant 3.200000e+01 : f32
    %8 = vector.broadcast %cst_7 : f32 to vector<8x1xf32>
    %9 = arith.divf %7, %8 : vector<8x1xf32>
    %cst_8 = arith.constant 9.99999974E-6 : f32
    %10 = vector.broadcast %cst_8 : f32 to vector<8x1xf32>
    %11 = arith.addf %9, %10 : vector<8x1xf32>
    %12 = math.rsqrt %11 : vector<8x1xf32>
    %13 = vector.broadcast %12 : vector<8x1xf32> to vector<8x32xf32>
    %14 = arith.mulf %1, %13 : vector<8x32xf32>
    %15 = vector.broadcast %4 : vector<1x32xf32> to vector<8x32xf32>
    %16 = arith.mulf %14, %15 : vector<8x32xf32>
    %c0_9 = arith.constant 0 : index
    %c0_10 = arith.constant 0 : index
    %17 = vector.load %arg4[%c0_9, %c0_10] : memref<1x32xf32, #tpu.memory_space<vmem>>, vector<1x32xf32>
    %18 = arith.mulf %3, %3 : vector<8x32xf32>
    %cst_11 = arith.constant dense<0.000000e+00> : vector<8xf32>
    %19 = vector.multi_reduction <add>, %18, %cst_11 [1] : vector<8x32xf32> to vector<8xf32>
    %20 = vector.shape_cast %19 : vector<8xf32> to vector<8x1xf32>
    %cst_12 = arith.constant 3.200000e+01 : f32
    %21 = vector.broadcast %cst_12 : f32 to vector<8x1xf32>
    %22 = arith.divf %20, %21 : vector<8x1xf32>
    %cst_13 = arith.constant 9.99999974E-6 : f32
    %23 = vector.broadcast %cst_13 : f32 to vector<8x1xf32>
    %24 = arith.addf %22, %23 : vector<8x1xf32>
    %25 = math.rsqrt %24 : vector<8x1xf32>
    %26 = vector.broadcast %25 : vector<8x1xf32> to vector<8x32xf32>
    %27 = arith.mulf %3, %26 : vector<8x32xf32>
    %28 = vector.broadcast %17 : vector<1x32xf32> to vector<8x32xf32>
    %29 = arith.mulf %27, %28 : vector<8x32xf32>
    %c0_14 = arith.constant 0 : index
    %c0_15 = arith.constant 0 : index
    %30 = vector.load %arg5[%c0_14, %c0_15] : memref<32x192xf32, #tpu.memory_space<vmem>>, vector<32x192xf32>
    %cst_16 = arith.constant dense<0.000000e+00> : vector<8x192xf32>
    %31 = tpu.matmul %16, %30, %cst_16 {dimension_numbers = #tpu.dot_dimension_numbers<[1], [0], [0], [1], [0, 0, 1, 1], [], []>} : vector<8x32xf32>, vector<32x192xf32>, vector<8x192xf32> -> vector<8x192xf32>
    %32 = vector.extract_strided_slice %31 {offsets = [0, 0], sizes = [8, 64], strides = [1, 1]} : vector<8x192xf32> to vector<8x64xf32>
    %33 = vector.extract_strided_slice %31 {offsets = [0, 64], sizes = [8, 64], strides = [1, 1]} : vector<8x192xf32> to vector<8x64xf32>
    %34 = vector.extract_strided_slice %31 {offsets = [0, 128], sizes = [8, 64], strides = [1, 1]} : vector<8x192xf32> to vector<8x64xf32>
    %c0_17 = arith.constant 0 : index
    %c0_18 = arith.constant 0 : index
    %35 = vector.load %arg6[%c0_17, %c0_18] : memref<32x64xf32, #tpu.memory_space<vmem>>, vector<32x64xf32>
    %cst_19 = arith.constant dense<0.000000e+00> : vector<8x64xf32>
    %36 = tpu.matmul %29, %35, %cst_19 {dimension_numbers = #tpu.dot_dimension_numbers<[1], [0], [0], [1], [0, 0, 1, 1], [], []>} : vector<8x32xf32>, vector<32x64xf32>, vector<8x64xf32> -> vector<8x64xf32>
    %c0_20 = arith.constant 0 : index
    %c0_21 = arith.constant 0 : index
    %37 = vector.load %arg7[%c0_20, %c0_21] : memref<4x64xf32, #tpu.memory_space<vmem>>, vector<4x64xf32>
    %c0_22 = arith.constant 0 : index
    %c0_23 = arith.constant 0 : index
    %38 = vector.load %arg8[%c0_22, %c0_23] : memref<1x64xf32, #tpu.memory_space<vmem>>, vector<1x64xf32>
    %cst_24 = arith.constant 0.000000e+00 : f32
    %39 = vector.broadcast %cst_24 : f32 to vector<8x64xf32>
    %cst_25 = arith.constant 0.000000e+00 : f32
    %40 = vector.broadcast %cst_25 : f32 to vector<3x64xf32>
    %41 = vector.extract_strided_slice %32 {offsets = [0, 0], sizes = [5, 64], strides = [1, 1]} : vector<8x64xf32> to vector<5x64xf32>
    %42 = tpu.concatenate %40, %41 in 0 : vector<3x64xf32>, vector<5x64xf32> -> vector<8x64xf32>
    %43 = vector.extract_strided_slice %37 {offsets = [0, 0], sizes = [1, 64], strides = [1, 1]} : vector<4x64xf32> to vector<1x64xf32>
    %44 = vector.broadcast %43 : vector<1x64xf32> to vector<8x64xf32>
    %45 = arith.mulf %44, %42 : vector<8x64xf32>
    %46 = arith.addf %39, %45 : vector<8x64xf32>
    %cst_26 = arith.constant 0.000000e+00 : f32
    %47 = vector.broadcast %cst_26 : f32 to vector<2x64xf32>
    %48 = vector.extract_strided_slice %32 {offsets = [0, 0], sizes = [6, 64], strides = [1, 1]} : vector<8x64xf32> to vector<6x64xf32>
    %49 = tpu.concatenate %47, %48 in 0 : vector<2x64xf32>, vector<6x64xf32> -> vector<8x64xf32>
    %50 = vector.extract_strided_slice %37 {offsets = [1, 0], sizes = [1, 64], strides = [1, 1]} : vector<4x64xf32> to vector<1x64xf32>
    %51 = vector.broadcast %50 : vector<1x64xf32> to vector<8x64xf32>
    %52 = arith.mulf %51, %49 : vector<8x64xf32>
    %53 = arith.addf %46, %52 : vector<8x64xf32>
    %cst_27 = arith.constant 0.000000e+00 : f32
    %54 = vector.broadcast %cst_27 : f32 to vector<1x64xf32>
    %55 = vector.extract_strided_slice %32 {offsets = [0, 0], sizes = [7, 64], strides = [1, 1]} : vector<8x64xf32> to vector<7x64xf32>
    %56 = tpu.concatenate %54, %55 in 0 : vector<1x64xf32>, vector<7x64xf32> -> vector<8x64xf32>
    %57 = vector.extract_strided_slice %37 {offsets = [2, 0], sizes = [1, 64], strides = [1, 1]} : vector<4x64xf32> to vector<1x64xf32>
    %58 = vector.broadcast %57 : vector<1x64xf32> to vector<8x64xf32>
    %59 = arith.mulf %58, %56 : vector<8x64xf32>
    %60 = arith.addf %53, %59 : vector<8x64xf32>
    %61 = vector.extract_strided_slice %37 {offsets = [3, 0], sizes = [1, 64], strides = [1, 1]} : vector<4x64xf32> to vector<1x64xf32>
    %62 = vector.broadcast %61 : vector<1x64xf32> to vector<8x64xf32>
    %63 = arith.mulf %62, %32 : vector<8x64xf32>
    %64 = arith.addf %60, %63 : vector<8x64xf32>
    %65 = vector.broadcast %38 : vector<1x64xf32> to vector<8x64xf32>
    %66 = arith.addf %64, %65 : vector<8x64xf32>
    %c0_28 = arith.constant 0 : index
    %c0_29 = arith.constant 0 : index
    %67 = vector.load %arg9[%c0_28, %c0_29] : memref<4x64xf32, #tpu.memory_space<vmem>>, vector<4x64xf32>
    %c0_30 = arith.constant 0 : index
    %c0_31 = arith.constant 0 : index
    %68 = vector.load %arg10[%c0_30, %c0_31] : memref<1x64xf32, #tpu.memory_space<vmem>>, vector<1x64xf32>
    %cst_32 = arith.constant 0.000000e+00 : f32
    %69 = vector.broadcast %cst_32 : f32 to vector<8x64xf32>
    %cst_33 = arith.constant 0.000000e+00 : f32
    %70 = vector.broadcast %cst_33 : f32 to vector<3x64xf32>
    %71 = vector.extract_strided_slice %36 {offsets = [0, 0], sizes = [5, 64], strides = [1, 1]} : vector<8x64xf32> to vector<5x64xf32>
    %72 = tpu.concatenate %70, %71 in 0 : vector<3x64xf32>, vector<5x64xf32> -> vector<8x64xf32>
    %73 = vector.extract_strided_slice %67 {offsets = [0, 0], sizes = [1, 64], strides = [1, 1]} : vector<4x64xf32> to vector<1x64xf32>
    %74 = vector.broadcast %73 : vector<1x64xf32> to vector<8x64xf32>
    %75 = arith.mulf %74, %72 : vector<8x64xf32>
    %76 = arith.addf %69, %75 : vector<8x64xf32>
    %cst_34 = arith.constant 0.000000e+00 : f32
    %77 = vector.broadcast %cst_34 : f32 to vector<2x64xf32>
    %78 = vector.extract_strided_slice %36 {offsets = [0, 0], sizes = [6, 64], strides = [1, 1]} : vector<8x64xf32> to vector<6x64xf32>
    %79 = tpu.concatenate %77, %78 in 0 : vector<2x64xf32>, vector<6x64xf32> -> vector<8x64xf32>
    %80 = vector.extract_strided_slice %67 {offsets = [1, 0], sizes = [1, 64], strides = [1, 1]} : vector<4x64xf32> to vector<1x64xf32>
    %81 = vector.broadcast %80 : vector<1x64xf32> to vector<8x64xf32>
    %82 = arith.mulf %81, %79 : vector<8x64xf32>
    %83 = arith.addf %76, %82 : vector<8x64xf32>
    %cst_35 = arith.constant 0.000000e+00 : f32
    %84 = vector.broadcast %cst_35 : f32 to vector<1x64xf32>
    %85 = vector.extract_strided_slice %36 {offsets = [0, 0], sizes = [7, 64], strides = [1, 1]} : vector<8x64xf32> to vector<7x64xf32>
    %86 = tpu.concatenate %84, %85 in 0 : vector<1x64xf32>, vector<7x64xf32> -> vector<8x64xf32>
    %87 = vector.extract_strided_slice %67 {offsets = [2, 0], sizes = [1, 64], strides = [1, 1]} : vector<4x64xf32> to vector<1x64xf32>
    %88 = vector.broadcast %87 : vector<1x64xf32> to vector<8x64xf32>
    %89 = arith.mulf %88, %86 : vector<8x64xf32>
    %90 = arith.addf %83, %89 : vector<8x64xf32>
    %91 = vector.extract_strided_slice %67 {offsets = [3, 0], sizes = [1, 64], strides = [1, 1]} : vector<4x64xf32> to vector<1x64xf32>
    %92 = vector.broadcast %91 : vector<1x64xf32> to vector<8x64xf32>
    %93 = arith.mulf %92, %36 : vector<8x64xf32>
    %94 = arith.addf %90, %93 : vector<8x64xf32>
    %95 = vector.broadcast %68 : vector<1x64xf32> to vector<8x64xf32>
    %96 = arith.addf %94, %95 : vector<8x64xf32>
    %c0_36 = arith.constant 0 : index
    %c0_37 = arith.constant 0 : index
    %97 = vector.load %arg11[%c0_36, %c0_37] : memref<64x72xf32, #tpu.memory_space<vmem>>, vector<64x72xf32>
    %cst_38 = arith.constant dense<0.000000e+00> : vector<8x72xf32>
    %98 = tpu.matmul %96, %97, %cst_38 {dimension_numbers = #tpu.dot_dimension_numbers<[1], [0], [0], [1], [0, 0, 1, 1], [], []>} : vector<8x64xf32>, vector<64x72xf32>, vector<8x72xf32> -> vector<8x72xf32>
    %99 = vector.extract_strided_slice %98 {offsets = [0, 0], sizes = [8, 64], strides = [1, 1]} : vector<8x72xf32> to vector<8x64xf32>
    %c0_39 = arith.constant 0 : index
    %c0_40 = arith.constant 0 : index
    %100 = vector.load %arg12[%c0_39, %c0_40] : memref<1x64xf32, #tpu.memory_space<vmem>>, vector<1x64xf32>
    %101 = vector.broadcast %100 : vector<1x64xf32> to vector<8x64xf32>
    %102 = arith.addf %99, %101 : vector<8x64xf32>
    %cst_41 = arith.constant 0.000000e+00 : f32
    %103 = vector.broadcast %cst_41 : f32 to vector<8x64xf32>
    %104 = arith.maximumf %102, %103 : vector<8x64xf32>
    %105 = vector.broadcast %cst_41 : f32 to vector<8x64xf32>
    %106 = arith.subf %102, %105 : vector<8x64xf32>
    %107 = arith.cmpf one, %106, %106 : vector<8x64xf32>
    %108 = vector.broadcast %cst_41 : f32 to vector<8x64xf32>
    %109 = arith.addf %102, %108 : vector<8x64xf32>
    %110 = math.absf %106 : vector<8x64xf32>
    %cst_42 = arith.constant 0.000000e+00 : f32
    %111 = vector.broadcast %cst_42 : f32 to vector<8x64xf32>
    %112 = arith.subf %111, %110 : vector<8x64xf32>
    %113 = math.exp %112 : vector<8x64xf32>
    %114 = math.log1p %113 : vector<8x64xf32>
    %115 = arith.addf %104, %114 : vector<8x64xf32>
    %116 = arith.select %107, %109, %115 : vector<8x64xi1>, vector<8x64xf32>
    %117 = vector.extract_strided_slice %98 {offsets = [0, 64], sizes = [8, 4], strides = [1, 1]} : vector<8x72xf32> to vector<8x4xf32>
    %118 = vector.extract_strided_slice %98 {offsets = [0, 68], sizes = [8, 4], strides = [1, 1]} : vector<8x72xf32> to vector<8x4xf32>
    %c0_43 = arith.constant 0 : index
    %c0_44 = arith.constant 0 : index
    %119 = vector.load %arg13[%c0_43, %c0_44] : memref<4x64xf32, #tpu.memory_space<vmem>>, vector<4x64xf32>
    %c0_45 = arith.constant 0 : index
    %c0_46 = arith.constant 0 : index
    %120 = vector.load %arg14[%c0_45, %c0_46] : memref<4x64xf32, #tpu.memory_space<vmem>>, vector<4x64xf32>
    %121 = arith.mulf %116, %66 : vector<8x64xf32>
    %122 = vector.extract_strided_slice %119 {offsets = [0, 0], sizes = [1, 64], strides = [1, 1]} : vector<4x64xf32> to vector<1x64xf32>
    %123 = vector.broadcast %122 : vector<1x64xf32> to vector<8x64xf32>
    %124 = arith.mulf %116, %123 : vector<8x64xf32>
    %125 = math.exp %124 : vector<8x64xf32>
    %126 = vector.extract_strided_slice %119 {offsets = [1, 0], sizes = [1, 64], strides = [1, 1]} : vector<4x64xf32> to vector<1x64xf32>
    %127 = vector.broadcast %126 : vector<1x64xf32> to vector<8x64xf32>
    %128 = arith.mulf %116, %127 : vector<8x64xf32>
    %129 = math.exp %128 : vector<8x64xf32>
    %130 = vector.extract_strided_slice %119 {offsets = [2, 0], sizes = [1, 64], strides = [1, 1]} : vector<4x64xf32> to vector<1x64xf32>
    %131 = vector.broadcast %130 : vector<1x64xf32> to vector<8x64xf32>
    %132 = arith.mulf %116, %131 : vector<8x64xf32>
    %133 = math.exp %132 : vector<8x64xf32>
    %134 = vector.extract_strided_slice %119 {offsets = [3, 0], sizes = [1, 64], strides = [1, 1]} : vector<4x64xf32> to vector<1x64xf32>
    %135 = vector.broadcast %134 : vector<1x64xf32> to vector<8x64xf32>
    %136 = arith.mulf %116, %135 : vector<8x64xf32>
    %137 = math.exp %136 : vector<8x64xf32>
    %138 = vector.extract_strided_slice %120 {offsets = [0, 0], sizes = [1, 64], strides = [1, 1]} : vector<4x64xf32> to vector<1x64xf32>
    %139 = vector.broadcast %138 : vector<1x64xf32> to vector<8x64xf32>
    %140 = arith.mulf %116, %139 : vector<8x64xf32>
    %141 = math.exp %140 : vector<8x64xf32>
    %142 = vector.extract_strided_slice %120 {offsets = [1, 0], sizes = [1, 64], strides = [1, 1]} : vector<4x64xf32> to vector<1x64xf32>
    %143 = vector.broadcast %142 : vector<1x64xf32> to vector<8x64xf32>
    %144 = arith.mulf %116, %143 : vector<8x64xf32>
    %145 = math.exp %144 : vector<8x64xf32>
    %146 = vector.extract_strided_slice %120 {offsets = [2, 0], sizes = [1, 64], strides = [1, 1]} : vector<4x64xf32> to vector<1x64xf32>
    %147 = vector.broadcast %146 : vector<1x64xf32> to vector<8x64xf32>
    %148 = arith.mulf %116, %147 : vector<8x64xf32>
    %149 = math.exp %148 : vector<8x64xf32>
    %150 = vector.extract_strided_slice %120 {offsets = [3, 0], sizes = [1, 64], strides = [1, 1]} : vector<4x64xf32> to vector<1x64xf32>
    %151 = vector.broadcast %150 : vector<1x64xf32> to vector<8x64xf32>
    %152 = arith.mulf %116, %151 : vector<8x64xf32>
    %153 = math.exp %152 : vector<8x64xf32>
    %154 = vector.extract_strided_slice %117 {offsets = [0, 0], sizes = [8, 1], strides = [1, 1]} : vector<8x4xf32> to vector<8x1xf32>
    %155 = vector.extract_strided_slice %117 {offsets = [0, 1], sizes = [8, 1], strides = [1, 1]} : vector<8x4xf32> to vector<8x1xf32>
    %156 = vector.extract_strided_slice %117 {offsets = [0, 2], sizes = [8, 1], strides = [1, 1]} : vector<8x4xf32> to vector<8x1xf32>
    %157 = vector.extract_strided_slice %117 {offsets = [0, 3], sizes = [8, 1], strides = [1, 1]} : vector<8x4xf32> to vector<8x1xf32>
    %158 = vector.extract_strided_slice %118 {offsets = [0, 0], sizes = [8, 1], strides = [1, 1]} : vector<8x4xf32> to vector<8x1xf32>
    %159 = vector.extract_strided_slice %118 {offsets = [0, 1], sizes = [8, 1], strides = [1, 1]} : vector<8x4xf32> to vector<8x1xf32>
    %160 = vector.extract_strided_slice %118 {offsets = [0, 2], sizes = [8, 1], strides = [1, 1]} : vector<8x4xf32> to vector<8x1xf32>
    %161 = vector.extract_strided_slice %118 {offsets = [0, 3], sizes = [8, 1], strides = [1, 1]} : vector<8x4xf32> to vector<8x1xf32>
    %162 = vector.broadcast %154 : vector<8x1xf32> to vector<8x64xf32>
    %163 = arith.mulf %162, %121 : vector<8x64xf32>
    %164 = vector.broadcast %155 : vector<8x1xf32> to vector<8x64xf32>
    %165 = arith.mulf %164, %121 : vector<8x64xf32>
    %166 = vector.broadcast %156 : vector<8x1xf32> to vector<8x64xf32>
    %167 = arith.mulf %166, %121 : vector<8x64xf32>
    %168 = vector.broadcast %157 : vector<8x1xf32> to vector<8x64xf32>
    %169 = arith.mulf %168, %121 : vector<8x64xf32>
    %cst_47 = arith.constant 0.000000e+00 : f32
    %170 = vector.broadcast %cst_47 : f32 to vector<1x64xf32>
    %cst_48 = arith.constant 0.000000e+00 : f32
    %171 = vector.broadcast %cst_48 : f32 to vector<1x64xf32>
    %cst_49 = arith.constant 0.000000e+00 : f32
    %172 = vector.broadcast %cst_49 : f32 to vector<1x64xf32>
    %cst_50 = arith.constant 0.000000e+00 : f32
    %173 = vector.broadcast %cst_50 : f32 to vector<1x64xf32>
    %cst_51 = arith.constant 0.000000e+00 : f32
    %174 = vector.broadcast %cst_51 : f32 to vector<1x64xf32>
    %cst_52 = arith.constant 0.000000e+00 : f32
    %175 = vector.broadcast %cst_52 : f32 to vector<1x64xf32>
    %cst_53 = arith.constant 0.000000e+00 : f32
    %176 = vector.broadcast %cst_53 : f32 to vector<1x64xf32>
    %cst_54 = arith.constant 0.000000e+00 : f32
    %177 = vector.broadcast %cst_54 : f32 to vector<1x64xf32>
    %178 = vector.extract_strided_slice %116 {offsets = [0, 0], sizes = [1, 64], strides = [1, 1]} : vector<8x64xf32> to vector<1x64xf32>
    %179 = vector.extract_strided_slice %66 {offsets = [7, 0], sizes = [1, 64], strides = [1, 1]} : vector<8x64xf32> to vector<1x64xf32>
    %180 = arith.mulf %178, %179 : vector<1x64xf32>
    %cst_55 = arith.constant 0.000000e+00 : f32
    %181 = vector.broadcast %cst_55 : f32 to vector<1x64xf32>
    %cst_56 = arith.constant 0.000000e+00 : f32
    %182 = vector.broadcast %cst_56 : f32 to vector<1x64xf32>
    %183 = vector.extract_strided_slice %125 {offsets = [0, 0], sizes = [1, 64], strides = [1, 1]} : vector<8x64xf32> to vector<1x64xf32>
    %184 = arith.mulf %183, %170 : vector<1x64xf32>
    %185 = vector.extract_strided_slice %163 {offsets = [0, 0], sizes = [1, 64], strides = [1, 1]} : vector<8x64xf32> to vector<1x64xf32>
    %186 = arith.addf %184, %185 : vector<1x64xf32>
    %187 = vector.extract_strided_slice %141 {offsets = [0, 0], sizes = [1, 64], strides = [1, 1]} : vector<8x64xf32> to vector<1x64xf32>
    %188 = arith.mulf %187, %174 : vector<1x64xf32>
    %189 = vector.extract_strided_slice %154 {offsets = [0, 0], sizes = [1, 1], strides = [1, 1]} : vector<8x1xf32> to vector<1x1xf32>
    %190 = vector.broadcast %189 : vector<1x1xf32> to vector<1x64xf32>
    %191 = arith.mulf %190, %180 : vector<1x64xf32>
    %192 = arith.addf %188, %191 : vector<1x64xf32>
    %193 = vector.extract_strided_slice %158 {offsets = [0, 0], sizes = [1, 1], strides = [1, 1]} : vector<8x1xf32> to vector<1x1xf32>
    %194 = vector.broadcast %193 : vector<1x1xf32> to vector<1x64xf32>
    %195 = arith.mulf %194, %186 : vector<1x64xf32>
    %196 = arith.addf %181, %195 : vector<1x64xf32>
    %197 = vector.extract_strided_slice %158 {offsets = [0, 0], sizes = [1, 1], strides = [1, 1]} : vector<8x1xf32> to vector<1x1xf32>
    %198 = vector.broadcast %197 : vector<1x1xf32> to vector<1x64xf32>
    %199 = arith.mulf %198, %192 : vector<1x64xf32>
    %200 = arith.addf %182, %199 : vector<1x64xf32>
    %201 = vector.extract_strided_slice %129 {offsets = [0, 0], sizes = [1, 64], strides = [1, 1]} : vector<8x64xf32> to vector<1x64xf32>
    %202 = arith.mulf %201, %171 : vector<1x64xf32>
    %203 = vector.extract_strided_slice %165 {offsets = [0, 0], sizes = [1, 64], strides = [1, 1]} : vector<8x64xf32> to vector<1x64xf32>
    %204 = arith.addf %202, %203 : vector<1x64xf32>
    %205 = vector.extract_strided_slice %145 {offsets = [0, 0], sizes = [1, 64], strides = [1, 1]} : vector<8x64xf32> to vector<1x64xf32>
    %206 = arith.mulf %205, %175 : vector<1x64xf32>
    %207 = vector.extract_strided_slice %155 {offsets = [0, 0], sizes = [1, 1], strides = [1, 1]} : vector<8x1xf32> to vector<1x1xf32>
    %208 = vector.broadcast %207 : vector<1x1xf32> to vector<1x64xf32>
    %209 = arith.mulf %208, %180 : vector<1x64xf32>
    %210 = arith.addf %206, %209 : vector<1x64xf32>
    %211 = vector.extract_strided_slice %159 {offsets = [0, 0], sizes = [1, 1], strides = [1, 1]} : vector<8x1xf32> to vector<1x1xf32>
    %212 = vector.broadcast %211 : vector<1x1xf32> to vector<1x64xf32>
    %213 = arith.mulf %212, %204 : vector<1x64xf32>
    %214 = arith.addf %196, %213 : vector<1x64xf32>
    %215 = vector.extract_strided_slice %159 {offsets = [0, 0], sizes = [1, 1], strides = [1, 1]} : vector<8x1xf32> to vector<1x1xf32>
    %216 = vector.broadcast %215 : vector<1x1xf32> to vector<1x64xf32>
    %217 = arith.mulf %216, %210 : vector<1x64xf32>
    %218 = arith.addf %200, %217 : vector<1x64xf32>
    %219 = vector.extract_strided_slice %133 {offsets = [0, 0], sizes = [1, 64], strides = [1, 1]} : vector<8x64xf32> to vector<1x64xf32>
    %220 = arith.mulf %219, %172 : vector<1x64xf32>
    %221 = vector.extract_strided_slice %167 {offsets = [0, 0], sizes = [1, 64], strides = [1, 1]} : vector<8x64xf32> to vector<1x64xf32>
    %222 = arith.addf %220, %221 : vector<1x64xf32>
    %223 = vector.extract_strided_slice %149 {offsets = [0, 0], sizes = [1, 64], strides = [1, 1]} : vector<8x64xf32> to vector<1x64xf32>
    %224 = arith.mulf %223, %176 : vector<1x64xf32>
    %225 = vector.extract_strided_slice %156 {offsets = [0, 0], sizes = [1, 1], strides = [1, 1]} : vector<8x1xf32> to vector<1x1xf32>
    %226 = vector.broadcast %225 : vector<1x1xf32> to vector<1x64xf32>
    %227 = arith.mulf %226, %180 : vector<1x64xf32>
    %228 = arith.addf %224, %227 : vector<1x64xf32>
    %229 = vector.extract_strided_slice %160 {offsets = [0, 0], sizes = [1, 1], strides = [1, 1]} : vector<8x1xf32> to vector<1x1xf32>
    %230 = vector.broadcast %229 : vector<1x1xf32> to vector<1x64xf32>
    %231 = arith.mulf %230, %222 : vector<1x64xf32>
    %232 = arith.addf %214, %231 : vector<1x64xf32>
    %233 = vector.extract_strided_slice %160 {offsets = [0, 0], sizes = [1, 1], strides = [1, 1]} : vector<8x1xf32> to vector<1x1xf32>
    %234 = vector.broadcast %233 : vector<1x1xf32> to vector<1x64xf32>
    %235 = arith.mulf %234, %228 : vector<1x64xf32>
    %236 = arith.addf %218, %235 : vector<1x64xf32>
    %237 = vector.extract_strided_slice %137 {offsets = [0, 0], sizes = [1, 64], strides = [1, 1]} : vector<8x64xf32> to vector<1x64xf32>
    %238 = arith.mulf %237, %173 : vector<1x64xf32>
    %239 = vector.extract_strided_slice %169 {offsets = [0, 0], sizes = [1, 64], strides = [1, 1]} : vector<8x64xf32> to vector<1x64xf32>
    %240 = arith.addf %238, %239 : vector<1x64xf32>
    %241 = vector.extract_strided_slice %153 {offsets = [0, 0], sizes = [1, 64], strides = [1, 1]} : vector<8x64xf32> to vector<1x64xf32>
    %242 = arith.mulf %241, %177 : vector<1x64xf32>
    %243 = vector.extract_strided_slice %157 {offsets = [0, 0], sizes = [1, 1], strides = [1, 1]} : vector<8x1xf32> to vector<1x1xf32>
    %244 = vector.broadcast %243 : vector<1x1xf32> to vector<1x64xf32>
    %245 = arith.mulf %244, %180 : vector<1x64xf32>
    %246 = arith.addf %242, %245 : vector<1x64xf32>
    %247 = vector.extract_strided_slice %161 {offsets = [0, 0], sizes = [1, 1], strides = [1, 1]} : vector<8x1xf32> to vector<1x1xf32>
    %248 = vector.broadcast %247 : vector<1x1xf32> to vector<1x64xf32>
    %249 = arith.mulf %248, %240 : vector<1x64xf32>
    %250 = arith.addf %232, %249 : vector<1x64xf32>
    %251 = vector.extract_strided_slice %161 {offsets = [0, 0], sizes = [1, 1], strides = [1, 1]} : vector<8x1xf32> to vector<1x1xf32>
    %252 = vector.broadcast %251 : vector<1x1xf32> to vector<1x64xf32>
    %253 = arith.mulf %252, %246 : vector<1x64xf32>
    %254 = arith.addf %236, %253 : vector<1x64xf32>
    %255 = vector.extract_strided_slice %116 {offsets = [1, 0], sizes = [1, 64], strides = [1, 1]} : vector<8x64xf32> to vector<1x64xf32>
    %256 = vector.extract_strided_slice %66 {offsets = [6, 0], sizes = [1, 64], strides = [1, 1]} : vector<8x64xf32> to vector<1x64xf32>
    %257 = arith.mulf %255, %256 : vector<1x64xf32>
    %cst_57 = arith.constant 0.000000e+00 : f32
    %258 = vector.broadcast %cst_57 : f32 to vector<1x64xf32>
    %cst_58 = arith.constant 0.000000e+00 : f32
    %259 = vector.broadcast %cst_58 : f32 to vector<1x64xf32>
    %260 = vector.extract_strided_slice %125 {offsets = [1, 0], sizes = [1, 64], strides = [1, 1]} : vector<8x64xf32> to vector<1x64xf32>
    %261 = arith.mulf %260, %186 : vector<1x64xf32>
    %262 = vector.extract_strided_slice %163 {offsets = [1, 0], sizes = [1, 64], strides = [1, 1]} : vector<8x64xf32> to vector<1x64xf32>
    %263 = arith.addf %261, %262 : vector<1x64xf32>
    %264 = vector.extract_strided_slice %141 {offsets = [1, 0], sizes = [1, 64], strides = [1, 1]} : vector<8x64xf32> to vector<1x64xf32>
    %265 = arith.mulf %264, %192 : vector<1x64xf32>
    %266 = vector.extract_strided_slice %154 {offsets = [1, 0], sizes = [1, 1], strides = [1, 1]} : vector<8x1xf32> to vector<1x1xf32>
    %267 = vector.broadcast %266 : vector<1x1xf32> to vector<1x64xf32>
    %268 = arith.mulf %267, %257 : vector<1x64xf32>
    %269 = arith.addf %265, %268 : vector<1x64xf32>
    %270 = vector.extract_strided_slice %158 {offsets = [1, 0], sizes = [1, 1], strides = [1, 1]} : vector<8x1xf32> to vector<1x1xf32>
    %271 = vector.broadcast %270 : vector<1x1xf32> to vector<1x64xf32>
    %272 = arith.mulf %271, %263 : vector<1x64xf32>
    %273 = arith.addf %258, %272 : vector<1x64xf32>
    %274 = vector.extract_strided_slice %158 {offsets = [1, 0], sizes = [1, 1], strides = [1, 1]} : vector<8x1xf32> to vector<1x1xf32>
    %275 = vector.broadcast %274 : vector<1x1xf32> to vector<1x64xf32>
    %276 = arith.mulf %275, %269 : vector<1x64xf32>
    %277 = arith.addf %259, %276 : vector<1x64xf32>
    %278 = vector.extract_strided_slice %129 {offsets = [1, 0], sizes = [1, 64], strides = [1, 1]} : vector<8x64xf32> to vector<1x64xf32>
    %279 = arith.mulf %278, %204 : vector<1x64xf32>
    %280 = vector.extract_strided_slice %165 {offsets = [1, 0], sizes = [1, 64], strides = [1, 1]} : vector<8x64xf32> to vector<1x64xf32>
    %281 = arith.addf %279, %280 : vector<1x64xf32>
    %282 = vector.extract_strided_slice %145 {offsets = [1, 0], sizes = [1, 64], strides = [1, 1]} : vector<8x64xf32> to vector<1x64xf32>
    %283 = arith.mulf %282, %210 : vector<1x64xf32>
    %284 = vector.extract_strided_slice %155 {offsets = [1, 0], sizes = [1, 1], strides = [1, 1]} : vector<8x1xf32> to vector<1x1xf32>
    %285 = vector.broadcast %284 : vector<1x1xf32> to vector<1x64xf32>
    %286 = arith.mulf %285, %257 : vector<1x64xf32>
    %287 = arith.addf %283, %286 : vector<1x64xf32>
    %288 = vector.extract_strided_slice %159 {offsets = [1, 0], sizes = [1, 1], strides = [1, 1]} : vector<8x1xf32> to vector<1x1xf32>
    %289 = vector.broadcast %288 : vector<1x1xf32> to vector<1x64xf32>
    %290 = arith.mulf %289, %281 : vector<1x64xf32>
    %291 = arith.addf %273, %290 : vector<1x64xf32>
    %292 = vector.extract_strided_slice %159 {offsets = [1, 0], sizes = [1, 1], strides = [1, 1]} : vector<8x1xf32> to vector<1x1xf32>
    %293 = vector.broadcast %292 : vector<1x1xf32> to vector<1x64xf32>
    %294 = arith.mulf %293, %287 : vector<1x64xf32>
    %295 = arith.addf %277, %294 : vector<1x64xf32>
    %296 = vector.extract_strided_slice %133 {offsets = [1, 0], sizes = [1, 64], strides = [1, 1]} : vector<8x64xf32> to vector<1x64xf32>
    %297 = arith.mulf %296, %222 : vector<1x64xf32>
    %298 = vector.extract_strided_slice %167 {offsets = [1, 0], sizes = [1, 64], strides = [1, 1]} : vector<8x64xf32> to vector<1x64xf32>
    %299 = arith.addf %297, %298 : vector<1x64xf32>
    %300 = vector.extract_strided_slice %149 {offsets = [1, 0], sizes = [1, 64], strides = [1, 1]} : vector<8x64xf32> to vector<1x64xf32>
    %301 = arith.mulf %300, %228 : vector<1x64xf32>
    %302 = vector.extract_strided_slice %156 {offsets = [1, 0], sizes = [1, 1], strides = [1, 1]} : vector<8x1xf32> to vector<1x1xf32>
    %303 = vector.broadcast %302 : vector<1x1xf32> to vector<1x64xf32>
    %304 = arith.mulf %303, %257 : vector<1x64xf32>
    %305 = arith.addf %301, %304 : vector<1x64xf32>
    %306 = vector.extract_strided_slice %160 {offsets = [1, 0], sizes = [1, 1], strides = [1, 1]} : vector<8x1xf32> to vector<1x1xf32>
    %307 = vector.broadcast %306 : vector<1x1xf32> to vector<1x64xf32>
    %308 = arith.mulf %307, %299 : vector<1x64xf32>
    %309 = arith.addf %291, %308 : vector<1x64xf32>
    %310 = vector.extract_strided_slice %160 {offsets = [1, 0], sizes = [1, 1], strides = [1, 1]} : vector<8x1xf32> to vector<1x1xf32>
    %311 = vector.broadcast %310 : vector<1x1xf32> to vector<1x64xf32>
    %312 = arith.mulf %311, %305 : vector<1x64xf32>
    %313 = arith.addf %295, %312 : vector<1x64xf32>
    %314 = vector.extract_strided_slice %137 {offsets = [1, 0], sizes = [1, 64], strides = [1, 1]} : vector<8x64xf32> to vector<1x64xf32>
    %315 = arith.mulf %314, %240 : vector<1x64xf32>
    %316 = vector.extract_strided_slice %169 {offsets = [1, 0], sizes = [1, 64], strides = [1, 1]} : vector<8x64xf32> to vector<1x64xf32>
    %317 = arith.addf %315, %316 : vector<1x64xf32>
    %318 = vector.extract_strided_slice %153 {offsets = [1, 0], sizes = [1, 64], strides = [1, 1]} : vector<8x64xf32> to vector<1x64xf32>
    %319 = arith.mulf %318, %246 : vector<1x64xf32>
    %320 = vector.extract_strided_slice %157 {offsets = [1, 0], sizes = [1, 1], strides = [1, 1]} : vector<8x1xf32> to vector<1x1xf32>
    %321 = vector.broadcast %320 : vector<1x1xf32> to vector<1x64xf32>
    %322 = arith.mulf %321, %257 : vector<1x64xf32>
    %323 = arith.addf %319, %322 : vector<1x64xf32>
    %324 = vector.extract_strided_slice %161 {offsets = [1, 0], sizes = [1, 1], strides = [1, 1]} : vector<8x1xf32> to vector<1x1xf32>
    %325 = vector.broadcast %324 : vector<1x1xf32> to vector<1x64xf32>
    %326 = arith.mulf %325, %317 : vector<1x64xf32>
    %327 = arith.addf %309, %326 : vector<1x64xf32>
    %328 = vector.extract_strided_slice %161 {offsets = [1, 0], sizes = [1, 1], strides = [1, 1]} : vector<8x1xf32> to vector<1x1xf32>
    %329 = vector.broadcast %328 : vector<1x1xf32> to vector<1x64xf32>
    %330 = arith.mulf %329, %323 : vector<1x64xf32>
    %331 = arith.addf %313, %330 : vector<1x64xf32>
    %332 = vector.extract_strided_slice %116 {offsets = [2, 0], sizes = [1, 64], strides = [1, 1]} : vector<8x64xf32> to vector<1x64xf32>
    %333 = vector.extract_strided_slice %66 {offsets = [5, 0], sizes = [1, 64], strides = [1, 1]} : vector<8x64xf32> to vector<1x64xf32>
    %334 = arith.mulf %332, %333 : vector<1x64xf32>
    %cst_59 = arith.constant 0.000000e+00 : f32
    %335 = vector.broadcast %cst_59 : f32 to vector<1x64xf32>
    %cst_60 = arith.constant 0.000000e+00 : f32
    %336 = vector.broadcast %cst_60 : f32 to vector<1x64xf32>
    %337 = vector.extract_strided_slice %125 {offsets = [2, 0], sizes = [1, 64], strides = [1, 1]} : vector<8x64xf32> to vector<1x64xf32>
    %338 = arith.mulf %337, %263 : vector<1x64xf32>
    %339 = vector.extract_strided_slice %163 {offsets = [2, 0], sizes = [1, 64], strides = [1, 1]} : vector<8x64xf32> to vector<1x64xf32>
    %340 = arith.addf %338, %339 : vector<1x64xf32>
    %341 = vector.extract_strided_slice %141 {offsets = [2, 0], sizes = [1, 64], strides = [1, 1]} : vector<8x64xf32> to vector<1x64xf32>
    %342 = arith.mulf %341, %269 : vector<1x64xf32>
    %343 = vector.extract_strided_slice %154 {offsets = [2, 0], sizes = [1, 1], strides = [1, 1]} : vector<8x1xf32> to vector<1x1xf32>
    %344 = vector.broadcast %343 : vector<1x1xf32> to vector<1x64xf32>
    %345 = arith.mulf %344, %334 : vector<1x64xf32>
    %346 = arith.addf %342, %345 : vector<1x64xf32>
    %347 = vector.extract_strided_slice %158 {offsets = [2, 0], sizes = [1, 1], strides = [1, 1]} : vector<8x1xf32> to vector<1x1xf32>
    %348 = vector.broadcast %347 : vector<1x1xf32> to vector<1x64xf32>
    %349 = arith.mulf %348, %340 : vector<1x64xf32>
    %350 = arith.addf %335, %349 : vector<1x64xf32>
    %351 = vector.extract_strided_slice %158 {offsets = [2, 0], sizes = [1, 1], strides = [1, 1]} : vector<8x1xf32> to vector<1x1xf32>
    %352 = vector.broadcast %351 : vector<1x1xf32> to vector<1x64xf32>
    %353 = arith.mulf %352, %346 : vector<1x64xf32>
    %354 = arith.addf %336, %353 : vector<1x64xf32>
    %355 = vector.extract_strided_slice %129 {offsets = [2, 0], sizes = [1, 64], strides = [1, 1]} : vector<8x64xf32> to vector<1x64xf32>
    %356 = arith.mulf %355, %281 : vector<1x64xf32>
    %357 = vector.extract_strided_slice %165 {offsets = [2, 0], sizes = [1, 64], strides = [1, 1]} : vector<8x64xf32> to vector<1x64xf32>
    %358 = arith.addf %356, %357 : vector<1x64xf32>
    %359 = vector.extract_strided_slice %145 {offsets = [2, 0], sizes = [1, 64], strides = [1, 1]} : vector<8x64xf32> to vector<1x64xf32>
    %360 = arith.mulf %359, %287 : vector<1x64xf32>
    %361 = vector.extract_strided_slice %155 {offsets = [2, 0], sizes = [1, 1], strides = [1, 1]} : vector<8x1xf32> to vector<1x1xf32>
    %362 = vector.broadcast %361 : vector<1x1xf32> to vector<1x64xf32>
    %363 = arith.mulf %362, %334 : vector<1x64xf32>
    %364 = arith.addf %360, %363 : vector<1x64xf32>
    %365 = vector.extract_strided_slice %159 {offsets = [2, 0], sizes = [1, 1], strides = [1, 1]} : vector<8x1xf32> to vector<1x1xf32>
    %366 = vector.broadcast %365 : vector<1x1xf32> to vector<1x64xf32>
    %367 = arith.mulf %366, %358 : vector<1x64xf32>
    %368 = arith.addf %350, %367 : vector<1x64xf32>
    %369 = vector.extract_strided_slice %159 {offsets = [2, 0], sizes = [1, 1], strides = [1, 1]} : vector<8x1xf32> to vector<1x1xf32>
    %370 = vector.broadcast %369 : vector<1x1xf32> to vector<1x64xf32>
    %371 = arith.mulf %370, %364 : vector<1x64xf32>
    %372 = arith.addf %354, %371 : vector<1x64xf32>
    %373 = vector.extract_strided_slice %133 {offsets = [2, 0], sizes = [1, 64], strides = [1, 1]} : vector<8x64xf32> to vector<1x64xf32>
    %374 = arith.mulf %373, %299 : vector<1x64xf32>
    %375 = vector.extract_strided_slice %167 {offsets = [2, 0], sizes = [1, 64], strides = [1, 1]} : vector<8x64xf32> to vector<1x64xf32>
    %376 = arith.addf %374, %375 : vector<1x64xf32>
    %377 = vector.extract_strided_slice %149 {offsets = [2, 0], sizes = [1, 64], strides = [1, 1]} : vector<8x64xf32> to vector<1x64xf32>
    %378 = arith.mulf %377, %305 : vector<1x64xf32>
    %379 = vector.extract_strided_slice %156 {offsets = [2, 0], sizes = [1, 1], strides = [1, 1]} : vector<8x1xf32> to vector<1x1xf32>
    %380 = vector.broadcast %379 : vector<1x1xf32> to vector<1x64xf32>
    %381 = arith.mulf %380, %334 : vector<1x64xf32>
    %382 = arith.addf %378, %381 : vector<1x64xf32>
    %383 = vector.extract_strided_slice %160 {offsets = [2, 0], sizes = [1, 1], strides = [1, 1]} : vector<8x1xf32> to vector<1x1xf32>
    %384 = vector.broadcast %383 : vector<1x1xf32> to vector<1x64xf32>
    %385 = arith.mulf %384, %376 : vector<1x64xf32>
    %386 = arith.addf %368, %385 : vector<1x64xf32>
    %387 = vector.extract_strided_slice %160 {offsets = [2, 0], sizes = [1, 1], strides = [1, 1]} : vector<8x1xf32> to vector<1x1xf32>
    %388 = vector.broadcast %387 : vector<1x1xf32> to vector<1x64xf32>
    %389 = arith.mulf %388, %382 : vector<1x64xf32>
    %390 = arith.addf %372, %389 : vector<1x64xf32>
    %391 = vector.extract_strided_slice %137 {offsets = [2, 0], sizes = [1, 64], strides = [1, 1]} : vector<8x64xf32> to vector<1x64xf32>
    %392 = arith.mulf %391, %317 : vector<1x64xf32>
    %393 = vector.extract_strided_slice %169 {offsets = [2, 0], sizes = [1, 64], strides = [1, 1]} : vector<8x64xf32> to vector<1x64xf32>
    %394 = arith.addf %392, %393 : vector<1x64xf32>
    %395 = vector.extract_strided_slice %153 {offsets = [2, 0], sizes = [1, 64], strides = [1, 1]} : vector<8x64xf32> to vector<1x64xf32>
    %396 = arith.mulf %395, %323 : vector<1x64xf32>
    %397 = vector.extract_strided_slice %157 {offsets = [2, 0], sizes = [1, 1], strides = [1, 1]} : vector<8x1xf32> to vector<1x1xf32>
    %398 = vector.broadcast %397 : vector<1x1xf32> to vector<1x64xf32>
    %399 = arith.mulf %398, %334 : vector<1x64xf32>
    %400 = arith.addf %396, %399 : vector<1x64xf32>
    %401 = vector.extract_strided_slice %161 {offsets = [2, 0], sizes = [1, 1], strides = [1, 1]} : vector<8x1xf32> to vector<1x1xf32>
    %402 = vector.broadcast %401 : vector<1x1xf32> to vector<1x64xf32>
    %403 = arith.mulf %402, %394 : vector<1x64xf32>
    %404 = arith.addf %386, %403 : vector<1x64xf32>
    %405 = vector.extract_strided_slice %161 {offsets = [2, 0], sizes = [1, 1], strides = [1, 1]} : vector<8x1xf32> to vector<1x1xf32>
    %406 = vector.broadcast %405 : vector<1x1xf32> to vector<1x64xf32>
    %407 = arith.mulf %406, %400 : vector<1x64xf32>
    %408 = arith.addf %390, %407 : vector<1x64xf32>
    %409 = vector.extract_strided_slice %116 {offsets = [3, 0], sizes = [1, 64], strides = [1, 1]} : vector<8x64xf32> to vector<1x64xf32>
    %410 = vector.extract_strided_slice %66 {offsets = [4, 0], sizes = [1, 64], strides = [1, 1]} : vector<8x64xf32> to vector<1x64xf32>
    %411 = arith.mulf %409, %410 : vector<1x64xf32>
    %cst_61 = arith.constant 0.000000e+00 : f32
    %412 = vector.broadcast %cst_61 : f32 to vector<1x64xf32>
    %cst_62 = arith.constant 0.000000e+00 : f32
    %413 = vector.broadcast %cst_62 : f32 to vector<1x64xf32>
    %414 = vector.extract_strided_slice %125 {offsets = [3, 0], sizes = [1, 64], strides = [1, 1]} : vector<8x64xf32> to vector<1x64xf32>
    %415 = arith.mulf %414, %340 : vector<1x64xf32>
    %416 = vector.extract_strided_slice %163 {offsets = [3, 0], sizes = [1, 64], strides = [1, 1]} : vector<8x64xf32> to vector<1x64xf32>
    %417 = arith.addf %415, %416 : vector<1x64xf32>
    %418 = vector.extract_strided_slice %141 {offsets = [3, 0], sizes = [1, 64], strides = [1, 1]} : vector<8x64xf32> to vector<1x64xf32>
    %419 = arith.mulf %418, %346 : vector<1x64xf32>
    %420 = vector.extract_strided_slice %154 {offsets = [3, 0], sizes = [1, 1], strides = [1, 1]} : vector<8x1xf32> to vector<1x1xf32>
    %421 = vector.broadcast %420 : vector<1x1xf32> to vector<1x64xf32>
    %422 = arith.mulf %421, %411 : vector<1x64xf32>
    %423 = arith.addf %419, %422 : vector<1x64xf32>
    %424 = vector.extract_strided_slice %158 {offsets = [3, 0], sizes = [1, 1], strides = [1, 1]} : vector<8x1xf32> to vector<1x1xf32>
    %425 = vector.broadcast %424 : vector<1x1xf32> to vector<1x64xf32>
    %426 = arith.mulf %425, %417 : vector<1x64xf32>
    %427 = arith.addf %412, %426 : vector<1x64xf32>
    %428 = vector.extract_strided_slice %158 {offsets = [3, 0], sizes = [1, 1], strides = [1, 1]} : vector<8x1xf32> to vector<1x1xf32>
    %429 = vector.broadcast %428 : vector<1x1xf32> to vector<1x64xf32>
    %430 = arith.mulf %429, %423 : vector<1x64xf32>
    %431 = arith.addf %413, %430 : vector<1x64xf32>
    %432 = vector.extract_strided_slice %129 {offsets = [3, 0], sizes = [1, 64], strides = [1, 1]} : vector<8x64xf32> to vector<1x64xf32>
    %433 = arith.mulf %432, %358 : vector<1x64xf32>
    %434 = vector.extract_strided_slice %165 {offsets = [3, 0], sizes = [1, 64], strides = [1, 1]} : vector<8x64xf32> to vector<1x64xf32>
    %435 = arith.addf %433, %434 : vector<1x64xf32>
    %436 = vector.extract_strided_slice %145 {offsets = [3, 0], sizes = [1, 64], strides = [1, 1]} : vector<8x64xf32> to vector<1x64xf32>
    %437 = arith.mulf %436, %364 : vector<1x64xf32>
    %438 = vector.extract_strided_slice %155 {offsets = [3, 0], sizes = [1, 1], strides = [1, 1]} : vector<8x1xf32> to vector<1x1xf32>
    %439 = vector.broadcast %438 : vector<1x1xf32> to vector<1x64xf32>
    %440 = arith.mulf %439, %411 : vector<1x64xf32>
    %441 = arith.addf %437, %440 : vector<1x64xf32>
    %442 = vector.extract_strided_slice %159 {offsets = [3, 0], sizes = [1, 1], strides = [1, 1]} : vector<8x1xf32> to vector<1x1xf32>
    %443 = vector.broadcast %442 : vector<1x1xf32> to vector<1x64xf32>
    %444 = arith.mulf %443, %435 : vector<1x64xf32>
    %445 = arith.addf %427, %444 : vector<1x64xf32>
    %446 = vector.extract_strided_slice %159 {offsets = [3, 0], sizes = [1, 1], strides = [1, 1]} : vector<8x1xf32> to vector<1x1xf32>
    %447 = vector.broadcast %446 : vector<1x1xf32> to vector<1x64xf32>
    %448 = arith.mulf %447, %441 : vector<1x64xf32>
    %449 = arith.addf %431, %448 : vector<1x64xf32>
    %450 = vector.extract_strided_slice %133 {offsets = [3, 0], sizes = [1, 64], strides = [1, 1]} : vector<8x64xf32> to vector<1x64xf32>
    %451 = arith.mulf %450, %376 : vector<1x64xf32>
    %452 = vector.extract_strided_slice %167 {offsets = [3, 0], sizes = [1, 64], strides = [1, 1]} : vector<8x64xf32> to vector<1x64xf32>
    %453 = arith.addf %451, %452 : vector<1x64xf32>
    %454 = vector.extract_strided_slice %149 {offsets = [3, 0], sizes = [1, 64], strides = [1, 1]} : vector<8x64xf32> to vector<1x64xf32>
    %455 = arith.mulf %454, %382 : vector<1x64xf32>
    %456 = vector.extract_strided_slice %156 {offsets = [3, 0], sizes = [1, 1], strides = [1, 1]} : vector<8x1xf32> to vector<1x1xf32>
    %457 = vector.broadcast %456 : vector<1x1xf32> to vector<1x64xf32>
    %458 = arith.mulf %457, %411 : vector<1x64xf32>
    %459 = arith.addf %455, %458 : vector<1x64xf32>
    %460 = vector.extract_strided_slice %160 {offsets = [3, 0], sizes = [1, 1], strides = [1, 1]} : vector<8x1xf32> to vector<1x1xf32>
    %461 = vector.broadcast %460 : vector<1x1xf32> to vector<1x64xf32>
    %462 = arith.mulf %461, %453 : vector<1x64xf32>
    %463 = arith.addf %445, %462 : vector<1x64xf32>
    %464 = vector.extract_strided_slice %160 {offsets = [3, 0], sizes = [1, 1], strides = [1, 1]} : vector<8x1xf32> to vector<1x1xf32>
    %465 = vector.broadcast %464 : vector<1x1xf32> to vector<1x64xf32>
    %466 = arith.mulf %465, %459 : vector<1x64xf32>
    %467 = arith.addf %449, %466 : vector<1x64xf32>
    %468 = vector.extract_strided_slice %137 {offsets = [3, 0], sizes = [1, 64], strides = [1, 1]} : vector<8x64xf32> to vector<1x64xf32>
    %469 = arith.mulf %468, %394 : vector<1x64xf32>
    %470 = vector.extract_strided_slice %169 {offsets = [3, 0], sizes = [1, 64], strides = [1, 1]} : vector<8x64xf32> to vector<1x64xf32>
    %471 = arith.addf %469, %470 : vector<1x64xf32>
    %472 = vector.extract_strided_slice %153 {offsets = [3, 0], sizes = [1, 64], strides = [1, 1]} : vector<8x64xf32> to vector<1x64xf32>
    %473 = arith.mulf %472, %400 : vector<1x64xf32>
    %474 = vector.extract_strided_slice %157 {offsets = [3, 0], sizes = [1, 1], strides = [1, 1]} : vector<8x1xf32> to vector<1x1xf32>
    %475 = vector.broadcast %474 : vector<1x1xf32> to vector<1x64xf32>
    %476 = arith.mulf %475, %411 : vector<1x64xf32>
    %477 = arith.addf %473, %476 : vector<1x64xf32>
    %478 = vector.extract_strided_slice %161 {offsets = [3, 0], sizes = [1, 1], strides = [1, 1]} : vector<8x1xf32> to vector<1x1xf32>
    %479 = vector.broadcast %478 : vector<1x1xf32> to vector<1x64xf32>
    %480 = arith.mulf %479, %471 : vector<1x64xf32>
    %481 = arith.addf %463, %480 : vector<1x64xf32>
    %482 = vector.extract_strided_slice %161 {offsets = [3, 0], sizes = [1, 1], strides = [1, 1]} : vector<8x1xf32> to vector<1x1xf32>
    %483 = vector.broadcast %482 : vector<1x1xf32> to vector<1x64xf32>
    %484 = arith.mulf %483, %477 : vector<1x64xf32>
    %485 = arith.addf %467, %484 : vector<1x64xf32>
    %486 = vector.extract_strided_slice %116 {offsets = [4, 0], sizes = [1, 64], strides = [1, 1]} : vector<8x64xf32> to vector<1x64xf32>
    %487 = vector.extract_strided_slice %66 {offsets = [3, 0], sizes = [1, 64], strides = [1, 1]} : vector<8x64xf32> to vector<1x64xf32>
    %488 = arith.mulf %486, %487 : vector<1x64xf32>
    %cst_63 = arith.constant 0.000000e+00 : f32
    %489 = vector.broadcast %cst_63 : f32 to vector<1x64xf32>
    %cst_64 = arith.constant 0.000000e+00 : f32
    %490 = vector.broadcast %cst_64 : f32 to vector<1x64xf32>
    %491 = vector.extract_strided_slice %125 {offsets = [4, 0], sizes = [1, 64], strides = [1, 1]} : vector<8x64xf32> to vector<1x64xf32>
    %492 = arith.mulf %491, %417 : vector<1x64xf32>
    %493 = vector.extract_strided_slice %163 {offsets = [4, 0], sizes = [1, 64], strides = [1, 1]} : vector<8x64xf32> to vector<1x64xf32>
    %494 = arith.addf %492, %493 : vector<1x64xf32>
    %495 = vector.extract_strided_slice %141 {offsets = [4, 0], sizes = [1, 64], strides = [1, 1]} : vector<8x64xf32> to vector<1x64xf32>
    %496 = arith.mulf %495, %423 : vector<1x64xf32>
    %497 = vector.extract_strided_slice %154 {offsets = [4, 0], sizes = [1, 1], strides = [1, 1]} : vector<8x1xf32> to vector<1x1xf32>
    %498 = vector.broadcast %497 : vector<1x1xf32> to vector<1x64xf32>
    %499 = arith.mulf %498, %488 : vector<1x64xf32>
    %500 = arith.addf %496, %499 : vector<1x64xf32>
    %501 = vector.extract_strided_slice %158 {offsets = [4, 0], sizes = [1, 1], strides = [1, 1]} : vector<8x1xf32> to vector<1x1xf32>
    %502 = vector.broadcast %501 : vector<1x1xf32> to vector<1x64xf32>
    %503 = arith.mulf %502, %494 : vector<1x64xf32>
    %504 = arith.addf %489, %503 : vector<1x64xf32>
    %505 = vector.extract_strided_slice %158 {offsets = [4, 0], sizes = [1, 1], strides = [1, 1]} : vector<8x1xf32> to vector<1x1xf32>
    %506 = vector.broadcast %505 : vector<1x1xf32> to vector<1x64xf32>
    %507 = arith.mulf %506, %500 : vector<1x64xf32>
    %508 = arith.addf %490, %507 : vector<1x64xf32>
    %509 = vector.extract_strided_slice %129 {offsets = [4, 0], sizes = [1, 64], strides = [1, 1]} : vector<8x64xf32> to vector<1x64xf32>
    %510 = arith.mulf %509, %435 : vector<1x64xf32>
    %511 = vector.extract_strided_slice %165 {offsets = [4, 0], sizes = [1, 64], strides = [1, 1]} : vector<8x64xf32> to vector<1x64xf32>
    %512 = arith.addf %510, %511 : vector<1x64xf32>
    %513 = vector.extract_strided_slice %145 {offsets = [4, 0], sizes = [1, 64], strides = [1, 1]} : vector<8x64xf32> to vector<1x64xf32>
    %514 = arith.mulf %513, %441 : vector<1x64xf32>
    %515 = vector.extract_strided_slice %155 {offsets = [4, 0], sizes = [1, 1], strides = [1, 1]} : vector<8x1xf32> to vector<1x1xf32>
    %516 = vector.broadcast %515 : vector<1x1xf32> to vector<1x64xf32>
    %517 = arith.mulf %516, %488 : vector<1x64xf32>
    %518 = arith.addf %514, %517 : vector<1x64xf32>
    %519 = vector.extract_strided_slice %159 {offsets = [4, 0], sizes = [1, 1], strides = [1, 1]} : vector<8x1xf32> to vector<1x1xf32>
    %520 = vector.broadcast %519 : vector<1x1xf32> to vector<1x64xf32>
    %521 = arith.mulf %520, %512 : vector<1x64xf32>
    %522 = arith.addf %504, %521 : vector<1x64xf32>
    %523 = vector.extract_strided_slice %159 {offsets = [4, 0], sizes = [1, 1], strides = [1, 1]} : vector<8x1xf32> to vector<1x1xf32>
    %524 = vector.broadcast %523 : vector<1x1xf32> to vector<1x64xf32>
    %525 = arith.mulf %524, %518 : vector<1x64xf32>
    %526 = arith.addf %508, %525 : vector<1x64xf32>
    %527 = vector.extract_strided_slice %133 {offsets = [4, 0], sizes = [1, 64], strides = [1, 1]} : vector<8x64xf32> to vector<1x64xf32>
    %528 = arith.mulf %527, %453 : vector<1x64xf32>
    %529 = vector.extract_strided_slice %167 {offsets = [4, 0], sizes = [1, 64], strides = [1, 1]} : vector<8x64xf32> to vector<1x64xf32>
    %530 = arith.addf %528, %529 : vector<1x64xf32>
    %531 = vector.extract_strided_slice %149 {offsets = [4, 0], sizes = [1, 64], strides = [1, 1]} : vector<8x64xf32> to vector<1x64xf32>
    %532 = arith.mulf %531, %459 : vector<1x64xf32>
    %533 = vector.extract_strided_slice %156 {offsets = [4, 0], sizes = [1, 1], strides = [1, 1]} : vector<8x1xf32> to vector<1x1xf32>
    %534 = vector.broadcast %533 : vector<1x1xf32> to vector<1x64xf32>
    %535 = arith.mulf %534, %488 : vector<1x64xf32>
    %536 = arith.addf %532, %535 : vector<1x64xf32>
    %537 = vector.extract_strided_slice %160 {offsets = [4, 0], sizes = [1, 1], strides = [1, 1]} : vector<8x1xf32> to vector<1x1xf32>
    %538 = vector.broadcast %537 : vector<1x1xf32> to vector<1x64xf32>
    %539 = arith.mulf %538, %530 : vector<1x64xf32>
    %540 = arith.addf %522, %539 : vector<1x64xf32>
    %541 = vector.extract_strided_slice %160 {offsets = [4, 0], sizes = [1, 1], strides = [1, 1]} : vector<8x1xf32> to vector<1x1xf32>
    %542 = vector.broadcast %541 : vector<1x1xf32> to vector<1x64xf32>
    %543 = arith.mulf %542, %536 : vector<1x64xf32>
    %544 = arith.addf %526, %543 : vector<1x64xf32>
    %545 = vector.extract_strided_slice %137 {offsets = [4, 0], sizes = [1, 64], strides = [1, 1]} : vector<8x64xf32> to vector<1x64xf32>
    %546 = arith.mulf %545, %471 : vector<1x64xf32>
    %547 = vector.extract_strided_slice %169 {offsets = [4, 0], sizes = [1, 64], strides = [1, 1]} : vector<8x64xf32> to vector<1x64xf32>
    %548 = arith.addf %546, %547 : vector<1x64xf32>
    %549 = vector.extract_strided_slice %153 {offsets = [4, 0], sizes = [1, 64], strides = [1, 1]} : vector<8x64xf32> to vector<1x64xf32>
    %550 = arith.mulf %549, %477 : vector<1x64xf32>
    %551 = vector.extract_strided_slice %157 {offsets = [4, 0], sizes = [1, 1], strides = [1, 1]} : vector<8x1xf32> to vector<1x1xf32>
    %552 = vector.broadcast %551 : vector<1x1xf32> to vector<1x64xf32>
    %553 = arith.mulf %552, %488 : vector<1x64xf32>
    %554 = arith.addf %550, %553 : vector<1x64xf32>
    %555 = vector.extract_strided_slice %161 {offsets = [4, 0], sizes = [1, 1], strides = [1, 1]} : vector<8x1xf32> to vector<1x1xf32>
    %556 = vector.broadcast %555 : vector<1x1xf32> to vector<1x64xf32>
    %557 = arith.mulf %556, %548 : vector<1x64xf32>
    %558 = arith.addf %540, %557 : vector<1x64xf32>
    %559 = vector.extract_strided_slice %161 {offsets = [4, 0], sizes = [1, 1], strides = [1, 1]} : vector<8x1xf32> to vector<1x1xf32>
    %560 = vector.broadcast %559 : vector<1x1xf32> to vector<1x64xf32>
    %561 = arith.mulf %560, %554 : vector<1x64xf32>
    %562 = arith.addf %544, %561 : vector<1x64xf32>
    %563 = vector.extract_strided_slice %116 {offsets = [5, 0], sizes = [1, 64], strides = [1, 1]} : vector<8x64xf32> to vector<1x64xf32>
    %564 = vector.extract_strided_slice %66 {offsets = [2, 0], sizes = [1, 64], strides = [1, 1]} : vector<8x64xf32> to vector<1x64xf32>
    %565 = arith.mulf %563, %564 : vector<1x64xf32>
    %cst_65 = arith.constant 0.000000e+00 : f32
    %566 = vector.broadcast %cst_65 : f32 to vector<1x64xf32>
    %cst_66 = arith.constant 0.000000e+00 : f32
    %567 = vector.broadcast %cst_66 : f32 to vector<1x64xf32>
    %568 = vector.extract_strided_slice %125 {offsets = [5, 0], sizes = [1, 64], strides = [1, 1]} : vector<8x64xf32> to vector<1x64xf32>
    %569 = arith.mulf %568, %494 : vector<1x64xf32>
    %570 = vector.extract_strided_slice %163 {offsets = [5, 0], sizes = [1, 64], strides = [1, 1]} : vector<8x64xf32> to vector<1x64xf32>
    %571 = arith.addf %569, %570 : vector<1x64xf32>
    %572 = vector.extract_strided_slice %141 {offsets = [5, 0], sizes = [1, 64], strides = [1, 1]} : vector<8x64xf32> to vector<1x64xf32>
    %573 = arith.mulf %572, %500 : vector<1x64xf32>
    %574 = vector.extract_strided_slice %154 {offsets = [5, 0], sizes = [1, 1], strides = [1, 1]} : vector<8x1xf32> to vector<1x1xf32>
    %575 = vector.broadcast %574 : vector<1x1xf32> to vector<1x64xf32>
    %576 = arith.mulf %575, %565 : vector<1x64xf32>
    %577 = arith.addf %573, %576 : vector<1x64xf32>
    %578 = vector.extract_strided_slice %158 {offsets = [5, 0], sizes = [1, 1], strides = [1, 1]} : vector<8x1xf32> to vector<1x1xf32>
    %579 = vector.broadcast %578 : vector<1x1xf32> to vector<1x64xf32>
    %580 = arith.mulf %579, %571 : vector<1x64xf32>
    %581 = arith.addf %566, %580 : vector<1x64xf32>
    %582 = vector.extract_strided_slice %158 {offsets = [5, 0], sizes = [1, 1], strides = [1, 1]} : vector<8x1xf32> to vector<1x1xf32>
    %583 = vector.broadcast %582 : vector<1x1xf32> to vector<1x64xf32>
    %584 = arith.mulf %583, %577 : vector<1x64xf32>
    %585 = arith.addf %567, %584 : vector<1x64xf32>
    %586 = vector.extract_strided_slice %129 {offsets = [5, 0], sizes = [1, 64], strides = [1, 1]} : vector<8x64xf32> to vector<1x64xf32>
    %587 = arith.mulf %586, %512 : vector<1x64xf32>
    %588 = vector.extract_strided_slice %165 {offsets = [5, 0], sizes = [1, 64], strides = [1, 1]} : vector<8x64xf32> to vector<1x64xf32>
    %589 = arith.addf %587, %588 : vector<1x64xf32>
    %590 = vector.extract_strided_slice %145 {offsets = [5, 0], sizes = [1, 64], strides = [1, 1]} : vector<8x64xf32> to vector<1x64xf32>
    %591 = arith.mulf %590, %518 : vector<1x64xf32>
    %592 = vector.extract_strided_slice %155 {offsets = [5, 0], sizes = [1, 1], strides = [1, 1]} : vector<8x1xf32> to vector<1x1xf32>
    %593 = vector.broadcast %592 : vector<1x1xf32> to vector<1x64xf32>
    %594 = arith.mulf %593, %565 : vector<1x64xf32>
    %595 = arith.addf %591, %594 : vector<1x64xf32>
    %596 = vector.extract_strided_slice %159 {offsets = [5, 0], sizes = [1, 1], strides = [1, 1]} : vector<8x1xf32> to vector<1x1xf32>
    %597 = vector.broadcast %596 : vector<1x1xf32> to vector<1x64xf32>
    %598 = arith.mulf %597, %589 : vector<1x64xf32>
    %599 = arith.addf %581, %598 : vector<1x64xf32>
    %600 = vector.extract_strided_slice %159 {offsets = [5, 0], sizes = [1, 1], strides = [1, 1]} : vector<8x1xf32> to vector<1x1xf32>
    %601 = vector.broadcast %600 : vector<1x1xf32> to vector<1x64xf32>
    %602 = arith.mulf %601, %595 : vector<1x64xf32>
    %603 = arith.addf %585, %602 : vector<1x64xf32>
    %604 = vector.extract_strided_slice %133 {offsets = [5, 0], sizes = [1, 64], strides = [1, 1]} : vector<8x64xf32> to vector<1x64xf32>
    %605 = arith.mulf %604, %530 : vector<1x64xf32>
    %606 = vector.extract_strided_slice %167 {offsets = [5, 0], sizes = [1, 64], strides = [1, 1]} : vector<8x64xf32> to vector<1x64xf32>
    %607 = arith.addf %605, %606 : vector<1x64xf32>
    %608 = vector.extract_strided_slice %149 {offsets = [5, 0], sizes = [1, 64], strides = [1, 1]} : vector<8x64xf32> to vector<1x64xf32>
    %609 = arith.mulf %608, %536 : vector<1x64xf32>
    %610 = vector.extract_strided_slice %156 {offsets = [5, 0], sizes = [1, 1], strides = [1, 1]} : vector<8x1xf32> to vector<1x1xf32>
    %611 = vector.broadcast %610 : vector<1x1xf32> to vector<1x64xf32>
    %612 = arith.mulf %611, %565 : vector<1x64xf32>
    %613 = arith.addf %609, %612 : vector<1x64xf32>
    %614 = vector.extract_strided_slice %160 {offsets = [5, 0], sizes = [1, 1], strides = [1, 1]} : vector<8x1xf32> to vector<1x1xf32>
    %615 = vector.broadcast %614 : vector<1x1xf32> to vector<1x64xf32>
    %616 = arith.mulf %615, %607 : vector<1x64xf32>
    %617 = arith.addf %599, %616 : vector<1x64xf32>
    %618 = vector.extract_strided_slice %160 {offsets = [5, 0], sizes = [1, 1], strides = [1, 1]} : vector<8x1xf32> to vector<1x1xf32>
    %619 = vector.broadcast %618 : vector<1x1xf32> to vector<1x64xf32>
    %620 = arith.mulf %619, %613 : vector<1x64xf32>
    %621 = arith.addf %603, %620 : vector<1x64xf32>
    %622 = vector.extract_strided_slice %137 {offsets = [5, 0], sizes = [1, 64], strides = [1, 1]} : vector<8x64xf32> to vector<1x64xf32>
    %623 = arith.mulf %622, %548 : vector<1x64xf32>
    %624 = vector.extract_strided_slice %169 {offsets = [5, 0], sizes = [1, 64], strides = [1, 1]} : vector<8x64xf32> to vector<1x64xf32>
    %625 = arith.addf %623, %624 : vector<1x64xf32>
    %626 = vector.extract_strided_slice %153 {offsets = [5, 0], sizes = [1, 64], strides = [1, 1]} : vector<8x64xf32> to vector<1x64xf32>
    %627 = arith.mulf %626, %554 : vector<1x64xf32>
    %628 = vector.extract_strided_slice %157 {offsets = [5, 0], sizes = [1, 1], strides = [1, 1]} : vector<8x1xf32> to vector<1x1xf32>
    %629 = vector.broadcast %628 : vector<1x1xf32> to vector<1x64xf32>
    %630 = arith.mulf %629, %565 : vector<1x64xf32>
    %631 = arith.addf %627, %630 : vector<1x64xf32>
    %632 = vector.extract_strided_slice %161 {offsets = [5, 0], sizes = [1, 1], strides = [1, 1]} : vector<8x1xf32> to vector<1x1xf32>
    %633 = vector.broadcast %632 : vector<1x1xf32> to vector<1x64xf32>
    %634 = arith.mulf %633, %625 : vector<1x64xf32>
    %635 = arith.addf %617, %634 : vector<1x64xf32>
    %636 = vector.extract_strided_slice %161 {offsets = [5, 0], sizes = [1, 1], strides = [1, 1]} : vector<8x1xf32> to vector<1x1xf32>
    %637 = vector.broadcast %636 : vector<1x1xf32> to vector<1x64xf32>
    %638 = arith.mulf %637, %631 : vector<1x64xf32>
    %639 = arith.addf %621, %638 : vector<1x64xf32>
    %640 = vector.extract_strided_slice %116 {offsets = [6, 0], sizes = [1, 64], strides = [1, 1]} : vector<8x64xf32> to vector<1x64xf32>
    %641 = vector.extract_strided_slice %66 {offsets = [1, 0], sizes = [1, 64], strides = [1, 1]} : vector<8x64xf32> to vector<1x64xf32>
    %642 = arith.mulf %640, %641 : vector<1x64xf32>
    %cst_67 = arith.constant 0.000000e+00 : f32
    %643 = vector.broadcast %cst_67 : f32 to vector<1x64xf32>
    %cst_68 = arith.constant 0.000000e+00 : f32
    %644 = vector.broadcast %cst_68 : f32 to vector<1x64xf32>
    %645 = vector.extract_strided_slice %125 {offsets = [6, 0], sizes = [1, 64], strides = [1, 1]} : vector<8x64xf32> to vector<1x64xf32>
    %646 = arith.mulf %645, %571 : vector<1x64xf32>
    %647 = vector.extract_strided_slice %163 {offsets = [6, 0], sizes = [1, 64], strides = [1, 1]} : vector<8x64xf32> to vector<1x64xf32>
    %648 = arith.addf %646, %647 : vector<1x64xf32>
    %649 = vector.extract_strided_slice %141 {offsets = [6, 0], sizes = [1, 64], strides = [1, 1]} : vector<8x64xf32> to vector<1x64xf32>
    %650 = arith.mulf %649, %577 : vector<1x64xf32>
    %651 = vector.extract_strided_slice %154 {offsets = [6, 0], sizes = [1, 1], strides = [1, 1]} : vector<8x1xf32> to vector<1x1xf32>
    %652 = vector.broadcast %651 : vector<1x1xf32> to vector<1x64xf32>
    %653 = arith.mulf %652, %642 : vector<1x64xf32>
    %654 = arith.addf %650, %653 : vector<1x64xf32>
    %655 = vector.extract_strided_slice %158 {offsets = [6, 0], sizes = [1, 1], strides = [1, 1]} : vector<8x1xf32> to vector<1x1xf32>
    %656 = vector.broadcast %655 : vector<1x1xf32> to vector<1x64xf32>
    %657 = arith.mulf %656, %648 : vector<1x64xf32>
    %658 = arith.addf %643, %657 : vector<1x64xf32>
    %659 = vector.extract_strided_slice %158 {offsets = [6, 0], sizes = [1, 1], strides = [1, 1]} : vector<8x1xf32> to vector<1x1xf32>
    %660 = vector.broadcast %659 : vector<1x1xf32> to vector<1x64xf32>
    %661 = arith.mulf %660, %654 : vector<1x64xf32>
    %662 = arith.addf %644, %661 : vector<1x64xf32>
    %663 = vector.extract_strided_slice %129 {offsets = [6, 0], sizes = [1, 64], strides = [1, 1]} : vector<8x64xf32> to vector<1x64xf32>
    %664 = arith.mulf %663, %589 : vector<1x64xf32>
    %665 = vector.extract_strided_slice %165 {offsets = [6, 0], sizes = [1, 64], strides = [1, 1]} : vector<8x64xf32> to vector<1x64xf32>
    %666 = arith.addf %664, %665 : vector<1x64xf32>
    %667 = vector.extract_strided_slice %145 {offsets = [6, 0], sizes = [1, 64], strides = [1, 1]} : vector<8x64xf32> to vector<1x64xf32>
    %668 = arith.mulf %667, %595 : vector<1x64xf32>
    %669 = vector.extract_strided_slice %155 {offsets = [6, 0], sizes = [1, 1], strides = [1, 1]} : vector<8x1xf32> to vector<1x1xf32>
    %670 = vector.broadcast %669 : vector<1x1xf32> to vector<1x64xf32>
    %671 = arith.mulf %670, %642 : vector<1x64xf32>
    %672 = arith.addf %668, %671 : vector<1x64xf32>
    %673 = vector.extract_strided_slice %159 {offsets = [6, 0], sizes = [1, 1], strides = [1, 1]} : vector<8x1xf32> to vector<1x1xf32>
    %674 = vector.broadcast %673 : vector<1x1xf32> to vector<1x64xf32>
    %675 = arith.mulf %674, %666 : vector<1x64xf32>
    %676 = arith.addf %658, %675 : vector<1x64xf32>
    %677 = vector.extract_strided_slice %159 {offsets = [6, 0], sizes = [1, 1], strides = [1, 1]} : vector<8x1xf32> to vector<1x1xf32>
    %678 = vector.broadcast %677 : vector<1x1xf32> to vector<1x64xf32>
    %679 = arith.mulf %678, %672 : vector<1x64xf32>
    %680 = arith.addf %662, %679 : vector<1x64xf32>
    %681 = vector.extract_strided_slice %133 {offsets = [6, 0], sizes = [1, 64], strides = [1, 1]} : vector<8x64xf32> to vector<1x64xf32>
    %682 = arith.mulf %681, %607 : vector<1x64xf32>
    %683 = vector.extract_strided_slice %167 {offsets = [6, 0], sizes = [1, 64], strides = [1, 1]} : vector<8x64xf32> to vector<1x64xf32>
    %684 = arith.addf %682, %683 : vector<1x64xf32>
    %685 = vector.extract_strided_slice %149 {offsets = [6, 0], sizes = [1, 64], strides = [1, 1]} : vector<8x64xf32> to vector<1x64xf32>
    %686 = arith.mulf %685, %613 : vector<1x64xf32>
    %687 = vector.extract_strided_slice %156 {offsets = [6, 0], sizes = [1, 1], strides = [1, 1]} : vector<8x1xf32> to vector<1x1xf32>
    %688 = vector.broadcast %687 : vector<1x1xf32> to vector<1x64xf32>
    %689 = arith.mulf %688, %642 : vector<1x64xf32>
    %690 = arith.addf %686, %689 : vector<1x64xf32>
    %691 = vector.extract_strided_slice %160 {offsets = [6, 0], sizes = [1, 1], strides = [1, 1]} : vector<8x1xf32> to vector<1x1xf32>
    %692 = vector.broadcast %691 : vector<1x1xf32> to vector<1x64xf32>
    %693 = arith.mulf %692, %684 : vector<1x64xf32>
    %694 = arith.addf %676, %693 : vector<1x64xf32>
    %695 = vector.extract_strided_slice %160 {offsets = [6, 0], sizes = [1, 1], strides = [1, 1]} : vector<8x1xf32> to vector<1x1xf32>
    %696 = vector.broadcast %695 : vector<1x1xf32> to vector<1x64xf32>
    %697 = arith.mulf %696, %690 : vector<1x64xf32>
    %698 = arith.addf %680, %697 : vector<1x64xf32>
    %699 = vector.extract_strided_slice %137 {offsets = [6, 0], sizes = [1, 64], strides = [1, 1]} : vector<8x64xf32> to vector<1x64xf32>
    %700 = arith.mulf %699, %625 : vector<1x64xf32>
    %701 = vector.extract_strided_slice %169 {offsets = [6, 0], sizes = [1, 64], strides = [1, 1]} : vector<8x64xf32> to vector<1x64xf32>
    %702 = arith.addf %700, %701 : vector<1x64xf32>
    %703 = vector.extract_strided_slice %153 {offsets = [6, 0], sizes = [1, 64], strides = [1, 1]} : vector<8x64xf32> to vector<1x64xf32>
    %704 = arith.mulf %703, %631 : vector<1x64xf32>
    %705 = vector.extract_strided_slice %157 {offsets = [6, 0], sizes = [1, 1], strides = [1, 1]} : vector<8x1xf32> to vector<1x1xf32>
    %706 = vector.broadcast %705 : vector<1x1xf32> to vector<1x64xf32>
    %707 = arith.mulf %706, %642 : vector<1x64xf32>
    %708 = arith.addf %704, %707 : vector<1x64xf32>
    %709 = vector.extract_strided_slice %161 {offsets = [6, 0], sizes = [1, 1], strides = [1, 1]} : vector<8x1xf32> to vector<1x1xf32>
    %710 = vector.broadcast %709 : vector<1x1xf32> to vector<1x64xf32>
    %711 = arith.mulf %710, %702 : vector<1x64xf32>
    %712 = arith.addf %694, %711 : vector<1x64xf32>
    %713 = vector.extract_strided_slice %161 {offsets = [6, 0], sizes = [1, 1], strides = [1, 1]} : vector<8x1xf32> to vector<1x1xf32>
    %714 = vector.broadcast %713 : vector<1x1xf32> to vector<1x64xf32>
    %715 = arith.mulf %714, %708 : vector<1x64xf32>
    %716 = arith.addf %698, %715 : vector<1x64xf32>
    %717 = vector.extract_strided_slice %116 {offsets = [7, 0], sizes = [1, 64], strides = [1, 1]} : vector<8x64xf32> to vector<1x64xf32>
    %718 = vector.extract_strided_slice %66 {offsets = [0, 0], sizes = [1, 64], strides = [1, 1]} : vector<8x64xf32> to vector<1x64xf32>
    %719 = arith.mulf %717, %718 : vector<1x64xf32>
    %cst_69 = arith.constant 0.000000e+00 : f32
    %720 = vector.broadcast %cst_69 : f32 to vector<1x64xf32>
    %cst_70 = arith.constant 0.000000e+00 : f32
    %721 = vector.broadcast %cst_70 : f32 to vector<1x64xf32>
    %722 = vector.extract_strided_slice %125 {offsets = [7, 0], sizes = [1, 64], strides = [1, 1]} : vector<8x64xf32> to vector<1x64xf32>
    %723 = arith.mulf %722, %648 : vector<1x64xf32>
    %724 = vector.extract_strided_slice %163 {offsets = [7, 0], sizes = [1, 64], strides = [1, 1]} : vector<8x64xf32> to vector<1x64xf32>
    %725 = arith.addf %723, %724 : vector<1x64xf32>
    %726 = vector.extract_strided_slice %141 {offsets = [7, 0], sizes = [1, 64], strides = [1, 1]} : vector<8x64xf32> to vector<1x64xf32>
    %727 = arith.mulf %726, %654 : vector<1x64xf32>
    %728 = vector.extract_strided_slice %154 {offsets = [7, 0], sizes = [1, 1], strides = [1, 1]} : vector<8x1xf32> to vector<1x1xf32>
    %729 = vector.broadcast %728 : vector<1x1xf32> to vector<1x64xf32>
    %730 = arith.mulf %729, %719 : vector<1x64xf32>
    %731 = arith.addf %727, %730 : vector<1x64xf32>
    %732 = vector.extract_strided_slice %158 {offsets = [7, 0], sizes = [1, 1], strides = [1, 1]} : vector<8x1xf32> to vector<1x1xf32>
    %733 = vector.broadcast %732 : vector<1x1xf32> to vector<1x64xf32>
    %734 = arith.mulf %733, %725 : vector<1x64xf32>
    %735 = arith.addf %720, %734 : vector<1x64xf32>
    %736 = vector.extract_strided_slice %158 {offsets = [7, 0], sizes = [1, 1], strides = [1, 1]} : vector<8x1xf32> to vector<1x1xf32>
    %737 = vector.broadcast %736 : vector<1x1xf32> to vector<1x64xf32>
    %738 = arith.mulf %737, %731 : vector<1x64xf32>
    %739 = arith.addf %721, %738 : vector<1x64xf32>
    %740 = vector.extract_strided_slice %129 {offsets = [7, 0], sizes = [1, 64], strides = [1, 1]} : vector<8x64xf32> to vector<1x64xf32>
    %741 = arith.mulf %740, %666 : vector<1x64xf32>
    %742 = vector.extract_strided_slice %165 {offsets = [7, 0], sizes = [1, 64], strides = [1, 1]} : vector<8x64xf32> to vector<1x64xf32>
    %743 = arith.addf %741, %742 : vector<1x64xf32>
    %744 = vector.extract_strided_slice %145 {offsets = [7, 0], sizes = [1, 64], strides = [1, 1]} : vector<8x64xf32> to vector<1x64xf32>
    %745 = arith.mulf %744, %672 : vector<1x64xf32>
    %746 = vector.extract_strided_slice %155 {offsets = [7, 0], sizes = [1, 1], strides = [1, 1]} : vector<8x1xf32> to vector<1x1xf32>
    %747 = vector.broadcast %746 : vector<1x1xf32> to vector<1x64xf32>
    %748 = arith.mulf %747, %719 : vector<1x64xf32>
    %749 = arith.addf %745, %748 : vector<1x64xf32>
    %750 = vector.extract_strided_slice %159 {offsets = [7, 0], sizes = [1, 1], strides = [1, 1]} : vector<8x1xf32> to vector<1x1xf32>
    %751 = vector.broadcast %750 : vector<1x1xf32> to vector<1x64xf32>
    %752 = arith.mulf %751, %743 : vector<1x64xf32>
    %753 = arith.addf %735, %752 : vector<1x64xf32>
    %754 = vector.extract_strided_slice %159 {offsets = [7, 0], sizes = [1, 1], strides = [1, 1]} : vector<8x1xf32> to vector<1x1xf32>
    %755 = vector.broadcast %754 : vector<1x1xf32> to vector<1x64xf32>
    %756 = arith.mulf %755, %749 : vector<1x64xf32>
    %757 = arith.addf %739, %756 : vector<1x64xf32>
    %758 = vector.extract_strided_slice %133 {offsets = [7, 0], sizes = [1, 64], strides = [1, 1]} : vector<8x64xf32> to vector<1x64xf32>
    %759 = arith.mulf %758, %684 : vector<1x64xf32>
    %760 = vector.extract_strided_slice %167 {offsets = [7, 0], sizes = [1, 64], strides = [1, 1]} : vector<8x64xf32> to vector<1x64xf32>
    %761 = arith.addf %759, %760 : vector<1x64xf32>
    %762 = vector.extract_strided_slice %149 {offsets = [7, 0], sizes = [1, 64], strides = [1, 1]} : vector<8x64xf32> to vector<1x64xf32>
    %763 = arith.mulf %762, %690 : vector<1x64xf32>
    %764 = vector.extract_strided_slice %156 {offsets = [7, 0], sizes = [1, 1], strides = [1, 1]} : vector<8x1xf32> to vector<1x1xf32>
    %765 = vector.broadcast %764 : vector<1x1xf32> to vector<1x64xf32>
    %766 = arith.mulf %765, %719 : vector<1x64xf32>
    %767 = arith.addf %763, %766 : vector<1x64xf32>
    %768 = vector.extract_strided_slice %160 {offsets = [7, 0], sizes = [1, 1], strides = [1, 1]} : vector<8x1xf32> to vector<1x1xf32>
    %769 = vector.broadcast %768 : vector<1x1xf32> to vector<1x64xf32>
    %770 = arith.mulf %769, %761 : vector<1x64xf32>
    %771 = arith.addf %753, %770 : vector<1x64xf32>
    %772 = vector.extract_strided_slice %160 {offsets = [7, 0], sizes = [1, 1], strides = [1, 1]} : vector<8x1xf32> to vector<1x1xf32>
    %773 = vector.broadcast %772 : vector<1x1xf32> to vector<1x64xf32>
    %774 = arith.mulf %773, %767 : vector<1x64xf32>
    %775 = arith.addf %757, %774 : vector<1x64xf32>
    %776 = vector.extract_strided_slice %137 {offsets = [7, 0], sizes = [1, 64], strides = [1, 1]} : vector<8x64xf32> to vector<1x64xf32>
    %777 = arith.mulf %776, %702 : vector<1x64xf32>
    %778 = vector.extract_strided_slice %169 {offsets = [7, 0], sizes = [1, 64], strides = [1, 1]} : vector<8x64xf32> to vector<1x64xf32>
    %779 = arith.addf %777, %778 : vector<1x64xf32>
    %780 = vector.extract_strided_slice %153 {offsets = [7, 0], sizes = [1, 64], strides = [1, 1]} : vector<8x64xf32> to vector<1x64xf32>
    %781 = arith.mulf %780, %708 : vector<1x64xf32>
    %782 = vector.extract_strided_slice %157 {offsets = [7, 0], sizes = [1, 1], strides = [1, 1]} : vector<8x1xf32> to vector<1x1xf32>
    %783 = vector.broadcast %782 : vector<1x1xf32> to vector<1x64xf32>
    %784 = arith.mulf %783, %719 : vector<1x64xf32>
    %785 = arith.addf %781, %784 : vector<1x64xf32>
    %786 = vector.extract_strided_slice %161 {offsets = [7, 0], sizes = [1, 1], strides = [1, 1]} : vector<8x1xf32> to vector<1x1xf32>
    %787 = vector.broadcast %786 : vector<1x1xf32> to vector<1x64xf32>
    %788 = arith.mulf %787, %779 : vector<1x64xf32>
    %789 = arith.addf %771, %788 : vector<1x64xf32>
    %790 = vector.extract_strided_slice %161 {offsets = [7, 0], sizes = [1, 1], strides = [1, 1]} : vector<8x1xf32> to vector<1x1xf32>
    %791 = vector.broadcast %790 : vector<1x1xf32> to vector<1x64xf32>
    %792 = arith.mulf %791, %785 : vector<1x64xf32>
    %793 = arith.addf %775, %792 : vector<1x64xf32>
    %794 = tpu.concatenate %250, %327, %404, %481, %558, %635, %712, %789 in 0 : vector<1x64xf32>, vector<1x64xf32>, vector<1x64xf32>, vector<1x64xf32>, vector<1x64xf32>, vector<1x64xf32>, vector<1x64xf32>, vector<1x64xf32> -> vector<8x64xf32>
    %795 = tpu.concatenate %793, %716, %639, %562, %485, %408, %331, %254 in 0 : vector<1x64xf32>, vector<1x64xf32>, vector<1x64xf32>, vector<1x64xf32>, vector<1x64xf32>, vector<1x64xf32>, vector<1x64xf32>, vector<1x64xf32> -> vector<8x64xf32>
    %796 = arith.addf %794, %795 : vector<8x64xf32>
    %797 = arith.addf %796, %33 : vector<8x64xf32>
    %798 = arith.negf %34 : vector<8x64xf32>
    %799 = math.exp %798 : vector<8x64xf32>
    %cst_71 = arith.constant 1.000000e+00 : f32
    %800 = vector.broadcast %cst_71 : f32 to vector<8x64xf32>
    %801 = arith.addf %800, %799 : vector<8x64xf32>
    %802 = arith.divf %800, %801 : vector<8x64xf32>
    %803 = arith.mulf %34, %802 : vector<8x64xf32>
    %804 = arith.mulf %797, %803 : vector<8x64xf32>
    %c0_72 = arith.constant 0 : index
    %c0_73 = arith.constant 0 : index
    %805 = vector.load %arg15[%c0_72, %c0_73] : memref<64x32xf32, #tpu.memory_space<vmem>>, vector<64x32xf32>
    %cst_74 = arith.constant dense<0.000000e+00> : vector<8x32xf32>
    %806 = tpu.matmul %804, %805, %cst_74 {dimension_numbers = #tpu.dot_dimension_numbers<[1], [0], [0], [1], [0, 0, 1, 1], [], []>} : vector<8x64xf32>, vector<64x32xf32>, vector<8x32xf32> -> vector<8x32xf32>
    %c0_75 = arith.constant 0 : index
    %c0_76 = arith.constant 0 : index
    %c0_77 = arith.constant 0 : index
    %807 = vector.load %arg16[%c0_75, %c0_76, %c0_77] : memref<1x8x32xf32, #tpu.memory_space<vmem>>, vector<1x8x32xf32>
    %808 = vector.shape_cast %807 : vector<1x8x32xf32> to vector<8x32xf32>
    %809 = vector.shape_cast %806 : vector<8x32xf32> to vector<1x8x32xf32>
    tpu.vector_store %arg16[%c0_75, %c0_76, %c0_77], %809 {strides = array<i32>} : memref<1x8x32xf32, #tpu.memory_space<vmem>>, vector<1x8x32xf32>,
    return
  }
  func.func @transform_0(%arg0: i32) -> (i32, i32, i32) {
    %c0_i32 = arith.constant 0 : i32
    %c0_i32_0 = arith.constant 0 : i32
    %c0_i32_1 = arith.constant 0 : i32
    return %arg0, %c0_i32, %c0_i32_0 : i32, i32, i32
  }
  func.func @transform_1(%arg0: i32) -> (i32, i32, i32) {
    %c0_i32 = arith.constant 0 : i32
    %c0_i32_0 = arith.constant 0 : i32
    %c0_i32_1 = arith.constant 0 : i32
    return %arg0, %c0_i32, %c0_i32_0 : i32, i32, i32
  }
  func.func @transform_2(%arg0: i32) -> (i32, i32) {
    %c0_i32 = arith.constant 0 : i32
    %c0_i32_0 = arith.constant 0 : i32
    %c0_i32_1 = arith.constant 0 : i32
    return %c0_i32, %c0_i32_0 : i32, i32
  }
  func.func @transform_3(%arg0: i32) -> (i32, i32) {
    %c0_i32 = arith.constant 0 : i32
    %c0_i32_0 = arith.constant 0 : i32
    %c0_i32_1 = arith.constant 0 : i32
    return %c0_i32, %c0_i32_0 : i32, i32
  }
  func.func @transform_4(%arg0: i32) -> (i32, i32) {
    %c0_i32 = arith.constant 0 : i32
    %c0_i32_0 = arith.constant 0 : i32
    %c0_i32_1 = arith.constant 0 : i32
    return %c0_i32, %c0_i32_0 : i32, i32
  }
  func.func @transform_5(%arg0: i32) -> (i32, i32) {
    %c0_i32 = arith.constant 0 : i32
    %c0_i32_0 = arith.constant 0 : i32
    %c0_i32_1 = arith.constant 0 : i32
    return %c0_i32, %c0_i32_0 : i32, i32
  }
  func.func @transform_6(%arg0: i32) -> (i32, i32) {
    %c0_i32 = arith.constant 0 : i32
    %c0_i32_0 = arith.constant 0 : i32
    %c0_i32_1 = arith.constant 0 : i32
    return %c0_i32, %c0_i32_0 : i32, i32
  }
  func.func @transform_7(%arg0: i32) -> (i32, i32) {
    %c0_i32 = arith.constant 0 : i32
    %c0_i32_0 = arith.constant 0 : i32
    %c0_i32_1 = arith.constant 0 : i32
    return %c0_i32, %c0_i32_0 : i32, i32
  }
  func.func @transform_8(%arg0: i32) -> (i32, i32) {
    %c0_i32 = arith.constant 0 : i32
    %c0_i32_0 = arith.constant 0 : i32
    %c0_i32_1 = arith.constant 0 : i32
    return %c0_i32, %c0_i32_0 : i32, i32
  }
  func.func @transform_9(%arg0: i32) -> (i32, i32) {
    %c0_i32 = arith.constant 0 : i32
    %c0_i32_0 = arith.constant 0 : i32
    %c0_i32_1 = arith.constant 0 : i32
    return %c0_i32, %c0_i32_0 : i32, i32
  }
  func.func @transform_10(%arg0: i32) -> (i32, i32) {
    %c0_i32 = arith.constant 0 : i32
    %c0_i32_0 = arith.constant 0 : i32
    %c0_i32_1 = arith.constant 0 : i32
    return %c0_i32, %c0_i32_0 : i32, i32
  }
  func.func @transform_11(%arg0: i32) -> (i32, i32) {
    %c0_i32 = arith.constant 0 : i32
    %c0_i32_0 = arith.constant 0 : i32
    %c0_i32_1 = arith.constant 0 : i32
    return %c0_i32, %c0_i32_0 : i32, i32
  }
  func.func @transform_12(%arg0: i32) -> (i32, i32) {
    %c0_i32 = arith.constant 0 : i32
    %c0_i32_0 = arith.constant 0 : i32
    %c0_i32_1 = arith.constant 0 : i32
    return %c0_i32, %c0_i32_0 : i32, i32
  }
  func.func @transform_13(%arg0: i32) -> (i32, i32) {
    %c0_i32 = arith.constant 0 : i32
    %c0_i32_0 = arith.constant 0 : i32
    %c0_i32_1 = arith.constant 0 : i32
    return %c0_i32, %c0_i32_0 : i32, i32
  }
  func.func @transform_14(%arg0: i32) -> (i32, i32) {
    %c0_i32 = arith.constant 0 : i32
    %c0_i32_0 = arith.constant 0 : i32
    %c0_i32_1 = arith.constant 0 : i32
    return %c0_i32, %c0_i32_0 : i32, i32
  }
  func.func @transform_15(%arg0: i32) -> (i32, i32, i32) {
    %c0_i32 = arith.constant 0 : i32
    %c0_i32_0 = arith.constant 0 : i32
    %c0_i32_1 = arith.constant 0 : i32
    return %arg0, %c0_i32, %c0_i32_0 : i32, i32, i32
  }
}

</mosaic_0001>

<bundles_post_ra>
// kernel: tpu_custom_call.1
= control target key start
LH: loop header
LB: loop body
LE: loop exit
PB: predicated region body
PF: predicated region fallthrough
CT: control target
= control target key end

     0   :  { %s3153_s0 = inlined_call_operand.hbm [shape: f32[2,8,32], index: 0, kind: input, shape index: {}]   ;;  %s3154_s1 = inlined_call_operand.hbm [shape: f32[2,8,32], index: 1, kind: input, shape index: {}]   ;;  %s3155_s2 = inlined_call_operand.vmem [shape: f32[1,32], index: 2, kind: input, shape index: {}]   ;;  %s3156_s3 = inlined_call_operand.hbm [shape: f32[1,32], index: 3, kind: input, shape index: {}]   ;;  %s3157_s4 = inlined_call_operand.vmem [shape: f32[32,192], index: 4, kind: input, shape index: {}]   ;;  %s3158_s5 = inlined_call_operand.vmem [shape: f32[32,64], index: 5, kind: input, shape index: {}]   ;;  %s3159_s6 = inlined_call_operand.vmem [shape: f32[4,64], index: 6, kind: input, shape index: {}]   ;;  %s3160_s7 = inlined_call_operand.hbm [shape: f32[1,64], index: 7, kind: input, shape index: {}]   ;;  %s3161_s8 = inlined_call_operand.hbm [shape: f32[4,64], index: 8, kind: input, shape index: {}]   ;;  %s3162_s9 = inlined_call_operand.hbm [shape: f32[1,64], index: 9, kind: input, shape index: {}]   ;;  %s3163_s10 = inlined_call_operand.hbm [shape: f32[64,72], index: 10, kind: input, shape index: {}]   ;;  %s3164_s11 = inlined_call_operand.hbm [shape: f32[1,64], index: 11, kind: input, shape index: {}]   ;;  %s3165_s12 = inlined_call_operand.vmem [shape: f32[4,64], index: 12, kind: input, shape index: {}]   ;;  %s3166_s13 = inlined_call_operand.hbm [shape: f32[4,64], index: 13, kind: input, shape index: {}]   ;;  %s3167_s14 = inlined_call_operand.vmem [shape: f32[64,32], index: 14, kind: input, shape index: {}]   ;;  %s3168_s15 = inlined_call_operand.hbm [shape: f32[2,8,32], index: 15, kind: output, shape index: {}]  }
   0x1   :  { %3191 = sst [smem:[#allocation44_spill]] %s3156_s3 }
   0x2   :  { %3192 = sst [smem:[#allocation45_spill]] %s3160_s7 }
   0x3   :  { %3193 = sst [smem:[#allocation46_spill]] %s3161_s8 }
   0x4   :  { %3194 = sst [smem:[#allocation47_spill]] %s3162_s9 }
   0x5   :  { %3195 = sst [smem:[#allocation48_spill]] %s3163_s10 }
   0x6   :  { %3196 = sst [smem:[#allocation49_spill]] %s3164_s11 }
   0x7   :  { %3197 = sst [smem:[#allocation50_spill]] %s3165_s12 }
   0x8   :  { %3198 = sst [smem:[#allocation51_spill]] %s3166_s13 }
   0x9   :  { %3199 = sst [smem:[#allocation52_spill]] %s3167_s14 }
   0xa   :  { %3200 = sst [smem:[#allocation53_spill]] %s3168_s15 }
   0xb   :  { %20 = vsyncpa [#allocation3], 0 }
   0xc   :  { %22 = vsyncpa [#allocation3 + $0x1], 0 }
   0xd   :  { %23 = vsyncpa [#allocation6], 0 }
   0xe   :  { %25 = vsyncpa [#allocation6 + $0x1], 0 }
   0xf   :  { %26 = vsyncpa [#allocation9], 0 }
  0x10   :  { %27 = vsyncpa [#allocation12], 0 }
  0x11   :  { %28 = vsyncpa [#allocation15], 0 }
  0x12   :  { %29 = vsyncpa [#allocation4], 0 }
  0x13   :  { %31 = vsyncpa [#allocation4 + $0x1], 0  ;;  %s2370_s18 = smov 0   ;;  %s2372_s19 = smov 0  }
  0x14   :  { %s2374_s20 = smov 0   ;;  %s2376_s21 = smov 0  }
  0x15 LB: > { %3201 = sst [smem:[#allocation25_spill]] %s2265_s20  ;;  %s2394_s25 = sadd.s32 4294967295, %s2269_s21   ;;  %s2269_s21 = sphi %s2376_s21, %s3256_s21   ;;  %s2265_s20 = sphi %s2374_s20, %s3258_s20   ;;  %s2261_s19 = sphi %s2372_s19, %s3260_s19   ;;  %s2257_s18 = sphi %s2370_s18, %s3259_s18  }
  0x16   : > { %3202 = sst [smem:[#allocation26_spill]] %s2269_s21  ;;  %p1701_p0 = scmp.ge.s32.totalorder %s2269_s21, 1 }
  0x17   : > { %s3203_s3 = sld [smem:[#allocation44_spill]]  ;;  %p58_p1 = scmp.eq.s32.totalorder %s2394_s25, 0 }
  0x18   : > { %p393_p2 = scmp.lt.s32.totalorder %s2269_s21, 3  ;;  %s2271_s27 = smov [#allocation7]  }
  0x19   : > { %s410_s28 = sshll.u32 %s2271_s27, 4  ;;  %s3205_s7 = sld [smem:[#allocation45_spill]]  ;;  %s411_s28 = int_to_ptr.vmem [resolvable:$true] %s410_s28 }
  0x1a   : > { %p2399_p3 = pnand %p1701_p0, %p393_p2  ;;  %s2272_s22 = smov [#allocation8]  }
  0x1b   : > { %s431_s23 = sshll.u32 %s2272_s22, 4  ;;  %s3207_s9 = sld [smem:[#allocation47_spill]]  ;;  %s432_s23 = int_to_ptr.vmem [resolvable:$true] %s431_s23 }
  0x1c   : > { %p1769_p5 = pneg %p2399_p3  ;;  %s3208_s11 = sld [smem:[#allocation49_spill]] }
  0x1d   : > { %s408_s24 = sshll.u32 %s3203_s3, 4  ;;  %s2273_s14 = smov [#allocation11]   ;;  %s409_s24 = int_to_ptr.hbm [resolvable:$true] %s408_s24 }
  0x1e   : > { %p2411_p6 = pnand %p1769_p5, %p58_p1  ;;  %s455_s12 = sshll.u32 %s2273_s14, 4  ;;  %s456_s12 = int_to_ptr.vmem [resolvable:$true] %s455_s12 }
  0x1f   : > { %s429_s16 = sshll.u32 %s3205_s7, 4  ;;  %s2274_s22 = smov [#allocation14]   ;;  %s430_s16 = int_to_ptr.hbm [resolvable:$true] %s429_s16 }
  0x20   : > { %1772 = dma.hbm_to_vmem [thread:$0]  (!%p2411_p6), %s409_s24, 16, %s411_s28, [#allocation6]  }
  0x21   : > { %s453_s15 = sshll.u32 %s3207_s9, 4  ;;  %s481_s3 = sshll.u32 %s2274_s22, 4  ;;  %s454_s15 = int_to_ptr.hbm [resolvable:$true] %s453_s15  ;;  %s482_s3 = int_to_ptr.vmem [resolvable:$true] %s481_s3 }
  0x22   : > { %1775 = dma.hbm_to_vmem [thread:$0]  (!%p2411_p6), %s430_s16, 16, %s432_s23, [#allocation9]  }
  0x23   : > { %s479_s7 = sshll.u32 %s3208_s11, 4  ;;  %s3209_s8 = sld [smem:[#allocation46_spill]]  ;;  %s480_s7 = int_to_ptr.hbm [resolvable:$true] %s479_s7 }
  0x24   : > { %1781 = dma.hbm_to_vmem [thread:$0]  (!%p2411_p6), %s454_s15, 16, %s456_s12, [#allocation12]  }
  0x25   : > { %1787 = dma.hbm_to_vmem [thread:$0]  (!%p2411_p6), %s480_s7, 16, %s482_s3, [#allocation15]  }
  0x26   : > { %s3210_s10 = sld [smem:[#allocation48_spill]]  ;;  %s2275_s14 = smov [#allocation10]  }
  0x27   : > { %s443_s29 = sshll.u32 %s2275_s14, 4  ;;  %s2276_s9 = smov [#allocation13]   ;;  %s444_s29 = int_to_ptr.vmem [resolvable:$true] %s443_s29 }
  0x28   : > { %s466_s12 = sshll.u32 %s2276_s9, 4  ;;  %s2277_s7 = smov 128   ;;  %s467_s12 = int_to_ptr.vmem [resolvable:$true] %s466_s12 }
  0x29   : > { %s441_s24 = sshll.u32 %s3209_s8, 4  ;;  %s2278_s15 = smov 8   ;;  %s442_s24 = int_to_ptr.hbm [resolvable:$true] %s441_s24 }
  0x2a   : > { %1778 = dma.hbm_to_vmem [thread:$0]  (!%p2411_p6), %s442_s24, 64, %s444_s29, [#allocation9]  }
  0x2b   : > { %s3211_s13 = sld [smem:[#allocation51_spill]]  ;;  %s2279_s27 = smov [#allocation16]  }
  0x2c   : > { %s464_s23 = sshll.u32 %s3210_s10, 4  ;;  %s496_s24 = sshll.u32 %s2279_s27, 4  ;;  %s465_s23 = int_to_ptr.hbm [resolvable:$true] %s464_s23  ;;  %s497_s24 = int_to_ptr.vmem [resolvable:$true] %s496_s24 }
  0x2d   : > { %1784 = dma.hbm_to_vmem [thread:$0]  (!%p2411_p6), %s465_s23, 1024, %s467_s12, [#allocation12], %s2277_s7, %s2277_s7, %s2278_s15  }
  0x2e   : > { %s1700_s28 = sadd.s32 4294967294, %s2269_s21   ;;  %s2446_s16 = sadd.s32 1, %s2269_s21  }
  0x2f   : > { %3212 = sst [smem:[#allocation27_spill]] %s2446_s16  ;;  %s44_s14 = sadd.s32 1, %s2265_s20 }
  0x30   : > { %s41_s23 = ssub.s32 %s2269_s21, %s2446_s16  ;;  %p51_p7 = scmp.ne.s32.totalorder %s2265_s20, %s2261_s19 }
  0x31   : > { %s494_s3 = sshll.u32 %s3211_s13, 4  ;;  %p42_p8 = scmp.eq.s32.totalorder %s41_s23, 0  ;;  %s495_s3 = int_to_ptr.hbm [resolvable:$true] %s494_s3 }
  0x32   : > { %1790 = dma.hbm_to_vmem [thread:$0]  (!%p2411_p6), %s495_s3, 64, %s497_s24, [#allocation15]  }
  0x33   : > { %p52_p9 = scmp.eq.s32.totalorder %s2269_s21, 0  ;;  %p57_p10 = scmp.ne.s32.totalorder %s2261_s19, %s2257_s18 }
  0x34   : > { %p380_p11 = scmp.eq.s32.totalorder %s2394_s25, 1  ;;  %p386_p2 = scmp.eq.s32.totalorder %s1700_s28, 1 }
  0x35   : > { %s2458_s29 = scalar_select %p42_p8, %s2265_s20, %s44_s14  }
  0x36   : > { %p2460_p12 = por %p52_p9, %p51_p7  ;;  %p2466_p13 = por %p58_p1, %p57_p10 }
  0x37   : > { %3213 = sst [smem:[#allocation28_spill]] %s2458_s29  ;;  %p2470_p0 = por %p380_p11, %p51_p7 }
  0x38   : > { %p1809_p5 = scmp.lt.s32.totalorder %s2269_s21, 2  ;;  %s510_s7 = sand.u32 1, %s2265_s20  }
  0x39   : > { %p2476_p6 = por %p386_p2, %p57_p10  ;;  %s1710_s30 = sshll.u32 %s510_s7, 3 }
  0x3a   : > { %s1711_s22 = sshll.u32 %s2269_s21, 3  ;;  %s514_s23 = scalar_lea.vmem [#allocation2], %s1710_s30 }
  0x3b   : > { %s518_s24 = scalar_lea.hbm %s3153_s0, %s1711_s22  ;;  %s522_s8 = sshll.u32 %s514_s23, 4  ;;  %s523_s8 = int_to_ptr.vmem [resolvable:$true] %s522_s8 }
  0x3c   : > { %s520_s14 = sshll.u32 %s518_s24, 4  ;;  %p2486_p7 = pnand %p1809_p5, %p2460_p12  ;;  %s521_s14 = int_to_ptr.hbm [resolvable:$true] %s520_s14 }
  0x3d   : > { %s537_s13 = scalar_lea.hbm %s3154_s1, %s1711_s22  ;;  %s529_s29 = sand.u32 1, %s2269_s21  }
  0x3e   : > { %s511_s20 = scalar_lea.sflag [#allocation3], %s510_s7  ;;  %s2123_s3 = sshra.s32 %s521_s14, 4  ;;  %s2124_s3 = int_to_ptr.hbm [resolvable:$true] %s2123_s3 }
  0x3f   : > { %s2125_s27 = scalar_lea.hbm %s2124_s3, 8  ;;  %p2127_p9 = pneg %p2486_p7 }
  0x40   : > { %p2126_p8 = scmp.ne.s32.totalorder %s2124_s3, %s2125_s27  ;;  %s2130_s23 = scalar_lea.hbm %s3153_s0, 16 }
  0x41   : > { %p2131_p12 = scmp.lt.s32.totalorder %s2124_s3, %s3153_s0  ;;  %p2132_p2 = scmp.lt.s32.totalorder %s2130_s23, %s2125_s27 }
  0x42   : > { %p2128_p10 = pnand %p2127_p9, %p2126_p8 }
  0x43   : > { %p2133_p5 = por %p2132_p2, %p2131_p12 }
  0x44   : > { %p2129_p11 = pneg %p2128_p10 }
  0x46   : > { %p2134_p4 = pnand %p2133_p5, %p2129_p11 }
  0x48   : > { %2137 = shalt.err (!%p2134_p4)
}
  0x49   : > { %1794 = dma.hbm_to_vmem [thread:$0]  (!%p2486_p7), %s521_s14, 128, %s523_s8, %s511_s20  }
  0x4a   : > { %s539_s7 = sshll.u32 %s537_s13, 4  ;;  %s533_s22 = scalar_lea.vmem [#allocation5], %s1710_s30  ;;  %s540_s7 = int_to_ptr.hbm [resolvable:$true] %s539_s7 }
  0x4b   : > { %s541_s16 = sshll.u32 %s533_s22, 4  ;;  %s530_s21 = scalar_lea.sflag [#allocation6], %s529_s29  ;;  %s542_s16 = int_to_ptr.vmem [resolvable:$true] %s541_s16 }
  0x4c   : > { %s2153_s9 = sshra.s32 %s540_s7, 4  ;;  %s2160_s23 = scalar_lea.hbm %s3154_s1, 16  ;;  %s2154_s9 = int_to_ptr.hbm [resolvable:$true] %s2153_s9 }
  0x4d   : > { %s2155_s24 = scalar_lea.hbm %s2154_s9, 8  ;;  %p2161_p4 = scmp.lt.s32.totalorder %s2154_s9, %s3154_s1 }
  0x4e   : > { %p2156_p8 = scmp.ne.s32.totalorder %s2154_s9, %s2155_s24  ;;  %p2162_p11 = scmp.lt.s32.totalorder %s2160_s23, %s2155_s24 }
  0x50   : > { %p2158_p10 = pnand %p2156_p8, %p2127_p9  ;;  %p2163_p2 = por %p2162_p11, %p2161_p4 }
  0x52   : > { %p2159_p12 = pneg %p2158_p10 }
  0x54   : > { %p2164_p5 = pnand %p2163_p2, %p2159_p12 }
  0x56   : > { %2167 = shalt.err (!%p2164_p5)
}
  0x57   : > { %1797 = dma.hbm_to_vmem [thread:$0]  (!%p2486_p7), %s540_s7, 128, %s542_s16, %s530_s21  }
  0x58   : > { %550 = sbr.rel (%p2399_p3) target bundleno = 857 (0x359), region = 80 }
  0x5d   : > { %s2521_s13 = sand.u32 1, %s2261_s19  }
  0x5e   : > { %s2524_s20 = sshll.u32 %s2521_s13, 3  ;;  %s553_s29 = scalar_lea.sflag [#allocation3], %s2521_s13 }
  0x5f   : > { %s556_s30 = scalar_lea.vmem [#allocation2], %s2524_s20 }
  0x60   : > { %2228 = dma.done.wait (%p2466_p13), %s553_s29, 128  }
  0x61   : > { %2230 = vsyncadd (%p2466_p13), %s553_s29, 4294967168  ;;  %s562_s21 = sand.u32 1, %s2394_s25   ;;  %s566_s16 = scalar_lea.vmem [#allocation5], %s2524_s20 }
  0x62   : > { %s563_s26 = scalar_lea.sflag [#allocation6], %s562_s21 }
  0x63   : > { %2232 = dma.done.wait (%p2466_p13), %s563_s26, 128  }
  0x64   : > { %2234 = vsyncadd (%p2466_p13), %s563_s26, 4294967168 }
  0x65   : > { %2236 = dma.done.wait (%p58_p1), [#allocation6], 16  }
  0x66   : > { %2238 = vsyncadd (%p58_p1), [#allocation6], 4294967280 }
  0x67   : > { %2240 = dma.done.wait (%p58_p1), [#allocation9], 80  }
  0x68   : > { %2242 = vsyncadd (%p58_p1), [#allocation9], 4294967216 }
  0x69   : > { %2244 = dma.done.wait (%p58_p1), [#allocation12], 1040  }
  0x6a   : > { %2246 = vsyncadd (%p58_p1), [#allocation12], 4294966256 }
  0x6b   : > { %2248 = dma.done.wait (%p58_p1), [#allocation15], 80  }
  0x6c   : > { %2250 = vsyncadd (%p58_p1), [#allocation15], 4294967216  ;;  %v655_v0 = vld [vmem:[%s566_s16] sm:$0xff]  ;;  %vm658_vm0 = vcmask 261120   ;;  %v2280_v3 = vmov 32.0   ;;  %v760_v9 = vld [vmem:[%s3158_s5 + $0x8] sm:$0xff] }
  0x6d   : > { %v687_v1 = vmul.f32 %v655_v0, %v655_v0  ;;  %1883 = vrcp.f32 %v2280_v3  ;;  %v762_v7 = vld [vmem:[%s3158_s5 + $0x18] sm:$0xff]  ;;  %v761_v8 = vld [vmem:[%s3158_s5 + $0x10] sm:$0xff]  ;;  %v759_v11 = vld [vmem:[%s3158_s5] sm:$0xff]  ;;  %v2281_v43 = vmov 68   ;;  %v2282_v45 = vmov 66   ;;  %s2289_s23 = smov 64  }
  0x6e   : > { %778 = vmatpush.msra.mxu2 %v762_v7  ;;  %v2569_v13 = vld [vmem:[%s556_s30] sm:$0xff]  ;;  %v850_v32 = vld [vmem:[#allocation13 + $0x28] sm:$0xff]  ;;  %1873 = vset.pattern.permute.xlu0 %v2281_v43  ;;  %v2283_v46 = vmov 64   ;;  %vm791_vm8 = vcmask 1042432   ;;  %vm798_vm9 = vcmask 1041408   ;;  %vm805_vm10 = vcmask 1040384  }
  0x6f   : > { %v688_v2 = vsel %vm658_vm0, %v687_v1, 0.0  ;;  %v852_v14 = vld [vmem:[#allocation13 + $0x38] sm:$0xff]  ;;  %v657_v15 = vmul.f32 %v2569_v13, %v2569_v13  ;;  %v1878_v27 = vld [vmem:[#allocation7] ss:$0 sm:$0xff]  ;;  %v849_v33 = vld [vmem:[#allocation13 + $0x20] sm:$0xff]  ;;  %1871 = vset.pattern.permute.xlu2 %v2282_v45  ;;  %1869 = vset.pattern.permute.xlu1 %v2283_v46  ;;  %vm853_vm11 = vcmask 523264  }
  0x70   : > { %689 = vadd.xlane.f32.xlu0 %v688_v2  ;;  %779 = vmatpush.msra.mxu2 %v761_v8  ;;  %v851_v31 = vld [vmem:[#allocation13 + $0x30] sm:$0xff]  ;;  %v848_v34 = vld [vmem:[#allocation13 + $0x18] sm:$0xff]  ;;  %v846_v38 = vld [vmem:[#allocation13 + $0x8] sm:$0xff]  ;;  %s3219_s29 = sld [smem:[#allocation50_spill]]  ;;  %vm1428_vm14 = vcmask 1043456   ;;  %vm1430_vm15 = vcmask 1044480  }
  0x71   : > { %865 = vmatpush.msra.mxu3 %v852_v14  ;;  %v659_v17 = vsel %vm658_vm0, %v657_v15, 0.0  ;;  %v847_v36 = vld [vmem:[#allocation13 + $0x10] sm:$0xff]  ;;  %v845_v39 = vld [vmem:[#allocation13] sm:$0xff]  ;;  %v817_v60 = vld [vmem:[#allocation10] sm:$0xf]  ;;  %s3243_s26 = sld [smem:[#allocation52_spill]] }
  0x72   : > { %780 = vmatpush.msra.mxu2 %v760_v9  ;;  %v714_v41 = vld [vmem:[%s3157_s4 + $0x30] sm:$0xff]  ;;  %v712_v42 = vld [vmem:[%s3157_s4 + $0x20] sm:$0xff]  ;;  %v715_v49 = vld [vmem:[%s3157_s4 + $0x38] sm:$0xff]  ;;  %v823_v63 = vperm.slane %v817_v60, 0  ;;  %s3253_s16 = sld [smem:[#allocation53_spill]]  ;;  %s653_s14 = scalar_lea.vmem [#allocation17], %s2524_s20 }
  0x73   : > { %v1884_v4 = vpop.eup %1883  ;;  %866 = vmatpush.msra.mxu3 %v851_v31  ;;  %731 = vmatpush.msra.mxu1 %v714_v41  ;;  %v710_v44 = vld [vmem:[%s3157_s4 + $0x10] sm:$0xff]  ;;  %v708_v47 = vld [vmem:[%s3157_s4] sm:$0xff]  ;;  %v713_v51 = vld [vmem:[%s3157_s4 + $0x28] sm:$0xff]  ;;  %s1538_s28 = sshll.u32 %s653_s14, 4  ;;  %s1526_s7 = scalar_lea.sflag [#allocation4], %s2521_s13  ;;  %s1539_s28 = int_to_ptr.vmem [resolvable:$true] %s1538_s28 }
  0x74   : > { %v663_v5 = vmul.f32 32.0, %v1884_v4  ;;  %781 = vmatpush.msra.mxu2 %v759_v11  ;;  %vm667_vm1 = vweird.f32 %v1884_v4  ;;  %v711_v53 = vld [vmem:[%s3157_s4 + $0x18] sm:$0xff]  ;;  %v709_v55 = vld [vmem:[%s3157_s4 + $0x8] sm:$0xff]  ;;  %v1880_v59 = vld [vmem:[%s3155_s2] ss:$0 sm:$0xff]  ;;  %v838_v11 = vperm.slane %v817_v60, 3 }
  0x75   : > { %867 = vmatpush.msra.mxu3 %v850_v32  ;;  %732 = vmatpush.msra.mxu1 %v712_v42 }
  0x76   : > { %v664_v6 = vsub.f32 1.0, %v663_v5 }
  0x77   : > { %868 = vmatpush.msra.mxu3 %v849_v33  ;;  %733 = vmatpush.msra.mxu1 %v710_v44 }
  0x78   : > { %v665_v10 = vmul.f32 %v1884_v4, %v664_v6  ;;  %660 = vadd.xlane.f32.xlu0 %v659_v17  ;;  %s2203_s3 = scalar_lea.hbm %s3253_s16, 16 }
  0x79   : > { %869 = vmatpush.msra.mxu3 %v848_v34  ;;  %734 = vmatpush.msra.mxu1 %v708_v47  ;;  %v2284_v34 = vmov 67  }
  0x7a   : > { %v666_v12 = vadd.f32 %v1884_v4, %v665_v10 }
  0x7b   : > { %870 = vmatpush.msra.mxu3 %v847_v36  ;;  %751 = vmatpush.msrb.mxu1 %v715_v49  ;;  %v2287_v49 = vmov 70  }
  0x7c   : > { %v668_v16 = vsel %vm667_vm1, %v1884_v4, %v666_v12  ;;  %v835_v4 = vperm.slane %v817_v60, 2  ;;  %vm1432_vm1 = vcmask 1045504  }
  0x7d   : > { %871 = vmatpush.msra.mxu3 %v846_v38  ;;  %752 = vmatpush.msrb.mxu1 %v713_v51 }
  0x7f   : > { %872 = vmatpush.msra.mxu3 %v845_v39  ;;  %753 = vmatpush.msrb.mxu1 %v711_v53 }
  0x81   : > { %754 = vmatpush.msrb.mxu1 %v709_v55 }
  0xe3   : > { %v690_v18 = vpop.xlane.xlu0 %689 }
  0xe4   : > { %v691_v19 = vmul.f32 %v690_v18, %v668_v16 }
  0xe6   : > { %v692_v20 = vadd.f32 1e-05, %v691_v19  ;;  %v1881_v19 = vld [vmem:[#allocation14] ss:$0 sm:$0xff] }
  0xe8   : > { %1885 = vrsqrt.f32 %v692_v20  ;;  %vm699_vm3 = vweird.f32 %v692_v20 }
  0xeb   : > { %v661_v35 = vpop.xlane.xlu0 %660 }
  0xec   : > { %v669_v37 = vmul.f32 %v668_v16, %v661_v35  ;;  %v1879_v16 = vld [vmem:[#allocation11] ss:$0 sm:$0xff]  ;;  %v2285_v35 = vmov 65  }
  0xee   : > { %v1886_v21 = vpop.eup %1885  ;;  %v670_v40 = vadd.f32 1e-05, %v669_v37 }
  0xef   : > { %v694_v22 = vmul.f32 %v1886_v21, %v692_v20  ;;  %vm700_vm2 = vweird.f32 %v1886_v21 }
  0xf0   : > { %vm701_vm4 = vmor %vm699_vm3, %vm700_vm2  ;;  %1887 = vrsqrt.f32 %v670_v40  ;;  %vm677_vm5 = vweird.f32 %v670_v40 }
  0xf1   : > { %v695_v23 = vmul.f32 %v1886_v21, %v694_v22 }
  0xf3   : > { %v696_v24 = vmul.f32 0.5, %v695_v23 }
  0xf5   : > { %v697_v25 = vsub.f32 1.5, %v696_v24  ;;  %v786_v24 = vld [vmem:[%s3159_s6] sm:$0xf] }
  0xf6   : > { %v1888_v48 = vpop.eup %1887  ;;  %v807_v38 = vperm.slane %v786_v24, 2  ;;  %v810_v43 = vperm.slane %v786_v24, 3 }
  0xf7   : > { %v698_v26 = vmul.f32 %v1886_v21, %v697_v25  ;;  %v672_v50 = vmul.f32 %v1888_v48, %v670_v40  ;;  %vm678_vm6 = vweird.f32 %v1888_v48  ;;  %v2286_v40 = vmov 71  }
  0xf8   : > { %vm679_vm7 = vmor %vm677_vm5, %vm678_vm6  ;;  %vm1434_vm5 = vcmask 1046528  }
  0xf9   : > { %v702_v28 = vsel %vm701_vm4, %v1886_v21, %v698_v26  ;;  %v673_v52 = vmul.f32 %v1888_v48, %v672_v50  ;;  %v2288_v50 = vmov 69  }
  0xfa   : > { %v703_v29 = vmul.f32 %v702_v28, %v655_v0  ;;  %v829_v0 = vperm.slane %v817_v60, 1  ;;  %v793_v28 = vperm.slane %v786_v24, 0 }
  0xfb   : > { %v674_v54 = vmul.f32 0.5, %v673_v52 }
  0xfc   : > { %v707_v30 = vmul.f32 %v1878_v27, %v703_v29  ;;  %v800_v29 = vperm.slane %v786_v24, 1 }
  0xfd   : > { %v675_v56 = vsub.f32 1.5, %v674_v54  ;;  %v1882_v54 = vld [vmem:[#allocation8] ss:$0 sm:$0xff] }
  0xfe   : > { %1727 = vmatmul.msk.f32.vlgmr.msra.gmra.mxu2 %vm658_vm0, %v707_v30 }
  0xff   : > { %v676_v57 = vmul.f32 %v1888_v48, %v675_v56 }
 0x101   : > { %v680_v58 = vsel %vm679_vm7, %v1888_v48, %v676_v57 }
 0x102   : > { %v681_v61 = vmul.f32 %v680_v58, %v2569_v13 }
 0x104   : > { %v685_v5 = vmul.f32 %v1880_v59, %v681_v61 }
 0x106   : > { %1725 = vmatmul.msk.f32.vlgmr.msra.gmra.mxu1 %vm658_vm0, %v685_v5 }
 0x10e   : > { %1726 = vmatmul.msk.f32.vlgmr.msrb.gmra.mxu1 %vm658_vm0, %v685_v5 }
 0x181   : > { %v783_v62 = vpop.f32.mrf.mxu2 }
 0x182   : > { %v820_v1 = vrot.slane %v783_v62, 5  ;;  %v826_v2 = vrot.slane %v783_v62, 6  ;;  %v832_v3 = vrot.slane %v783_v62, 7  ;;  %v839_v15 = vmul.f32 %v838_v11, %v783_v62 }
 0x183   : > { %v736_v21 = vpop.f32.mrf.mxu1 }
 0x184   : > { %v822_v6 = vsel %vm791_vm8, 0.0, %v820_v1  ;;  %v828_v7 = vsel %vm798_vm9, 0.0, %v826_v2  ;;  %v834_v8 = vsel %vm805_vm10, 0.0, %v832_v3  ;;  %v789_v25 = vrot.slane %v736_v21, 5 }
 0x185   : > { %v824_v9 = vmul.f32 %v823_v63, %v822_v6  ;;  %v830_v10 = vmul.f32 %v829_v0, %v828_v7  ;;  %v836_v13 = vmul.f32 %v835_v4, %v834_v8  ;;  %v796_v26 = vrot.slane %v736_v21, 6  ;;  %v900_v8 = vld [vmem:[%s3219_s29] sm:$0xf]  ;;  %s1732_s29 = sshll.u32 %s2394_s25, 3 }
 0x186   : > { %v792_v31 = vsel %vm791_vm8, 0.0, %v789_v25  ;;  %v803_v33 = vrot.slane %v736_v21, 7  ;;  %v811_v48 = vmul.f32 %v810_v43, %v736_v21  ;;  %s1536_s17 = scalar_lea.hbm %s3253_s16, %s1732_s29 }
 0x187   : > { %v831_v12 = vadd.f32 %v830_v10, %v824_v9  ;;  %v799_v32 = vsel %vm798_vm9, 0.0, %v796_v26  ;;  %v794_v36 = vmul.f32 %v793_v28, %v792_v31  ;;  %v901_v9 = vld [vmem:[#allocation16] sm:$0xf]  ;;  %v911_v10 = vperm.slane %v900_v8, 2  ;;  %s1540_s11 = sshll.u32 %s1536_s17, 4  ;;  %s1541_s11 = int_to_ptr.hbm [resolvable:$true] %s1540_s11 }
 0x188   : > { %v801_v37 = vmul.f32 %v800_v29, %v799_v32  ;;  %v806_v39 = vsel %vm805_vm10, 0.0, %v803_v33  ;;  %v927_v11 = vperm.slane %v901_v9, 2  ;;  %v907_v28 = vperm.slane %v900_v8, 1  ;;  %s2197_s22 = sshra.s32 %s1541_s11, 4  ;;  %s2198_s22 = int_to_ptr.hbm [resolvable:$true] %s2197_s22 }
 0x189   : > { %v837_v14 = vadd.f32 %v836_v13, %v831_v12  ;;  %v808_v42 = vmul.f32 %v807_v38, %v806_v39  ;;  %v919_v29 = vperm.slane %v901_v9, 0  ;;  %s2199_s9 = scalar_lea.hbm %s2198_s22, 8  ;;  %p2204_p7 = scmp.lt.s32.totalorder %s2198_s22, %s3253_s16 }
 0x18a   : > { %v802_v41 = vadd.f32 %v801_v37, %v794_v36  ;;  %v923_v36 = vperm.slane %v901_v9, 1  ;;  %p2200_p1 = scmp.ne.s32.totalorder %s2198_s22, %s2199_s9  ;;  %p2205_p9 = scmp.lt.s32.totalorder %s2203_s3, %s2199_s9 }
 0x18b   : > { %v840_v17 = vadd.f32 %v839_v15, %v837_v14  ;;  %v2628_v13 = vpop.f32.mrf.mxu1 }
 0x18c   : > { %v809_v47 = vadd.f32 %v808_v42, %v802_v41  ;;  %3220 = vst [vmem:[#allocation29_spill] sm:$0xff] %v2628_v13  ;;  %v1729_v15 = vmul.f32 -1.442695, %v2628_v13  ;;  %p2201_p3 = pnand %p2200_p1, %p2470_p0  ;;  %p2206_p8 = por %p2205_p9, %p2204_p7 }
 0x18d   : > { %v844_v18 = vadd.f32 %v1879_v16, %v840_v17  ;;  %v915_v17 = vperm.slane %v900_v8, 3 }
 0x18e   : > { %v812_v53 = vadd.f32 %v811_v48, %v809_v47  ;;  %p2202_p13 = pneg %p2201_p3 }
 0x18f   : > { %1728 = vmatmul.msk.f32.vlgmr.msra.gmra.mxu3 %vm853_vm11, %v844_v18 }
 0x190   : > { %v816_v59 = vadd.f32 %v1882_v54, %v812_v53  ;;  %p2207_p10 = pnand %p2206_p8, %p2202_p13 }
 0x192   : > { %v957_v63 = vrot.slane %v816_v59, 7  ;;  %v1012_v0 = vrot.slane %v816_v59, 5  ;;  %v1075_v1 = vrot.slane %v816_v59, 3  ;;  %v1138_v2 = vrot.slane %v816_v59, 1 }
 0x212   : > { %v874_v20 = vpop.f32.mrf.mxu3 }
 0x213   : > { %v881_v22 = vadd.f32 %v1881_v19, %v874_v20  ;;  %947 = vperm.xlu2 %1871, %v874_v20   ;;  %937 = vperm.xlu1 %1869, %v874_v20   ;;  %v931_v19 = vperm.slane %v901_v9, 3 }
 0x214   : > { %966 = vperm.xlu0 %1873, %v874_v20  }
 0x215   : > { %v885_v23 = vand.u32 2147483647, %v881_v22  ;;  %v882_v58 = vmax.f32 %v881_v22, 0.0  ;;  %vm883_vm13 = vcmp.ne.f32.partialorder %v881_v22, %v881_v22 }
 0x217   : > { %v886_v27 = vsub.f32 0.0, %v885_v23 }
 0x219   : > { %v887_v30 = vmul.f32 1.442695, %v886_v27  ;;  %v903_v27 = vperm.slane %v900_v8, 0 }
 0x21b   : > { %1889 = vpow2.f32 %v887_v30  ;;  %1872 = vset.pattern.permute.xlu2 %v2284_v34  ;;  %1870 = vset.pattern.permute.xlu1 %v2285_v35 }
 0x21c   : > { %952 = vperm.xlu2 %1872, %v874_v20   ;;  %942 = vperm.xlu1 %1870, %v874_v20  }
 0x21d   : > { %1877 = vset.pattern.permute.xlu0 %v2286_v40 }
 0x221   : > { %v1890_v44 = vpop.eup %1889 }
 0x222   : > { %v889_v45 = vadd.f32 1.0, %v1890_v44  ;;  %v892_v46 = vmul.f32 -0.5, %v1890_v44  ;;  %v895_v52 = vand.u32 2147483647, %v1890_v44 }
 0x224   : > { %1891 = vlog2.f32 %v889_v45  ;;  %1875 = vset.pattern.permute.xlu2 %v2287_v49  ;;  %1874 = vset.pattern.permute.xlu1 %v2288_v50  ;;  %v893_v51 = vadd.f32 1.0, %v892_v46  ;;  %vm896_vm12 = vcmp.lt.f32.partialorder %v895_v52, 0.0004427343 }
 0x225   : > { %992 = vperm.xlu2 %1875, %v874_v20   ;;  %979 = vperm.xlu1 %1874, %v874_v20   ;;  %1893 = vpow2.f32 %v1729_v15 }
 0x226   : > { %v894_v57 = vmul.f32 %v1890_v44, %v893_v51 }
 0x22a   : > { %v1892_v55 = vpop.eup %1891 }
 0x22b   : > { %v891_v56 = vmul.f32 0.6931472, %v1892_v55  ;;  %v1894_v23 = vpop.eup %1893 }
 0x22c   : > { %v2635_v30 = vadd.f32 1.0, %v1894_v23 }
 0x22d   : > { %v897_v60 = vsel %vm896_vm12, %v894_v57, %v891_v56  ;;  %1876 = vset.pattern.permute.xlu1 %v2286_v40  ;;  %1468 = vrot.lane.b32.xlu2 %v736_v21, %s2289_s23 }
 0x22e   : > { %v898_v61 = vadd.f32 %v897_v60, %v882_v58  ;;  %1005 = vperm.xlu1 %1876, %v874_v20   ;;  %3222 = vst [vmem:[#allocation31_spill] sm:$0xff] %v2635_v30 }
 0x230   : > { %v899_v62 = vsel %vm883_vm13, %v881_v22, %v898_v61 }
 0x231   : > { %v2615_v3 = vmul.f32 %v899_v62, %v816_v59  ;;  %v2617_v4 = vmul.f32 %v957_v63, %v899_v62  ;;  %v2619_v5 = vmul.f32 %v1012_v0, %v899_v62  ;;  %v2621_v6 = vmul.f32 %v1075_v1, %v899_v62 }
 0x232   : > { %v2623_v7 = vmul.f32 %v1138_v2, %v899_v62  ;;  %v912_v12 = vmul.f32 %v911_v10, %v899_v62  ;;  %v928_v14 = vmul.f32 %v927_v11, %v899_v62  ;;  %v916_v20 = vmul.f32 %v915_v17, %v899_v62 }
 0x233   : > { %v932_v21 = vmul.f32 %v931_v19, %v899_v62  ;;  %v904_v39 = vmul.f32 %v903_v27, %v899_v62  ;;  %v908_v41 = vmul.f32 %v907_v28, %v899_v62  ;;  %v920_v42 = vmul.f32 %v919_v29, %v899_v62 }
 0x234   : > { %v913_v16 = vmul.f32 1.442695, %v912_v12  ;;  %v929_v18 = vmul.f32 1.442695, %v928_v14  ;;  %v917_v22 = vmul.f32 1.442695, %v916_v20  ;;  %v924_v46 = vmul.f32 %v923_v36, %v899_v62 }
 0x235   : > { %v933_v24 = vmul.f32 1.442695, %v932_v21  ;;  %v905_v50 = vmul.f32 1.442695, %v904_v39  ;;  %v909_v51 = vmul.f32 1.442695, %v908_v41 }
 0x236   : > { %1895 = vpow2.f32 %v913_v16  ;;  %v921_v52 = vmul.f32 1.442695, %v920_v42  ;;  %v925_v61 = vmul.f32 1.442695, %v924_v46 }
 0x237   : > { %1897 = vpow2.f32 %v929_v18 }
 0x238   : > { %1899 = vpow2.f32 %v917_v22 }
 0x239   : > { %1901 = vpow2.f32 %v933_v24 }
 0x23a   : > { %1903 = vrcp.f32 %v2635_v30 }
 0x23b   : > { %1905 = vpow2.f32 %v905_v50 }
 0x23c   : > { %v2631_v25 = vpop.eup %1895  ;;  %1907 = vpow2.f32 %v909_v51 }
 0x23d   : > { %3221 = vst [vmem:[#allocation30_spill] sm:$0xff] %v2631_v25  ;;  %v2633_v26 = vpop.eup %1897  ;;  %v986_v35 = vmul.f32 0.0, %v2631_v25  ;;  %1909 = vpow2.f32 %v921_v52 }
 0x23e   : > { %v988_v33 = vmul.f32 0.0, %v2633_v26  ;;  %v2652_v40 = vpop.eup %1899  ;;  %1911 = vpow2.f32 %v925_v61 }
 0x23f   : > { %3224 = vst [vmem:[#allocation33_spill] sm:$0xff] %v2652_v40  ;;  %v2656_v45 = vpop.eup %1901  ;;  %v999_v60 = vmul.f32 0.0, %v2652_v40 }
 0x240   : > { %v2669_v56 = vpop.eup %1903  ;;  %v1001_v58 = vmul.f32 0.0, %v2656_v45 }
 0x241   : > { %3225 = vst [vmem:[#allocation34_spill] sm:$0xff] %v2669_v56  ;;  %v1477_v10 = vmul.f32 %v2669_v56, %v2635_v30  ;;  %v2703_v21 = vpop.eup %1905 }
 0x242   : > { %v2711_v27 = vpop.eup %1907 }
 0x243   : > { %v1478_v22 = vsub.f32 1.0, %v1477_v10 }
 0x26d   : > { %v948_v31 = vpop.permute.xlu2 %947 }
 0x26e   : > { %v2638_v32 = vmul.f32 %v948_v31, %v2615_v3  ;;  %v2642_v34 = vmul.f32 %v2617_v4, %v948_v31  ;;  %v2660_v48 = vmul.f32 %v2619_v5, %v948_v31  ;;  %v2689_v8 = vmul.f32 %v2621_v6, %v948_v31 }
 0x26f   : > { %v2715_v29 = vmul.f32 %v2623_v7, %v948_v31 }
 0x270   : > { %3223 = vst [vmem:[#allocation32_spill] sm:$0xff] %v2638_v32  ;;  %v2646_v37 = vadd.f32 %v2642_v34, %v988_v33  ;;  %v2649_v38 = vadd.f32 %v986_v35, %v2638_v32  ;;  %v2717_v33 = vpop.eup %1909 }
 0x271   : > { %v2720_v36 = vpop.eup %1911 }
 0x272   : > { %v1051_v43 = vrot.slane %v2646_v37, 7  ;;  %v1046_v44 = vrot.slane %v2649_v38, 7  ;;  %v975_v61 = vmul.f32 0.0, %v2720_v36 }
 0x274   : > { %v1053_v47 = vmul.f32 %v2633_v26, %v1051_v43  ;;  %v1048_v49 = vmul.f32 %v2631_v25, %v1046_v44  ;;  %v2726_v43 = vmul.f32 %v2669_v56, %v1478_v22 }
 0x276   : > { %v2664_v53 = vadd.f32 %v2660_v48, %v1053_v47  ;;  %v953_v54 = vpop.permute.xlu2 %952  ;;  %v2667_v55 = vadd.f32 %v1048_v49, %v2638_v32  ;;  %3226 = vst [vmem:[#allocation35_spill] sm:$0xff] %v2726_v43  ;;  %v960_v49 = vmul.f32 0.0, %v2703_v21 }
 0x277   : > { %v2672_v57 = vmul.f32 %v953_v54, %v2615_v3  ;;  %v2676_v59 = vmul.f32 %v2617_v4, %v953_v54  ;;  %v2700_v17 = vmul.f32 %v2619_v5, %v953_v54  ;;  %v2730_v31 = vmul.f32 %v2621_v6, %v953_v54 }
 0x278   : > { %v1114_v62 = vrot.slane %v2664_v53, 7  ;;  %v1109_v63 = vrot.slane %v2667_v55, 7 }
 0x279   : > { %v2682_v0 = vadd.f32 %v2676_v59, %v1001_v58  ;;  %v2685_v1 = vadd.f32 %v999_v60, %v2672_v57  ;;  %v962_v60 = vmul.f32 0.0, %v2717_v33 }
 0x27a   : > { %v1116_v2 = vmul.f32 %v2633_v26, %v1114_v62  ;;  %v1111_v9 = vmul.f32 %v2631_v25, %v1109_v63  ;;  %v973_v62 = vmul.f32 0.0, %v2711_v27 }
 0x27b   : > { %v1066_v11 = vrot.slane %v2682_v0, 7  ;;  %v1061_v12 = vrot.slane %v2685_v1, 7 }
 0x27c   : > { %v1118_v14 = vadd.f32 %v2689_v8, %v1116_v2  ;;  %v1112_v15 = vadd.f32 %v1111_v9, %v2638_v32  ;;  %v2745_v2 = vmul.f32 %v2623_v7, %v953_v54 }
 0x27d   : > { %v1068_v16 = vmul.f32 %v2656_v45, %v1066_v11  ;;  %v1063_v18 = vmul.f32 %v2652_v40, %v1061_v12 }
 0x27e   : > { %v1177_v19 = vrot.slane %v1118_v14, 7  ;;  %v1172_v20 = vrot.slane %v1112_v15, 7 }
 0x27f   : > { %v2706_v23 = vadd.f32 %v2700_v17, %v1068_v16  ;;  %v2709_v24 = vadd.f32 %v1063_v18, %v2672_v57  ;;  %v2732_v47 = vpop.permute.xlu2 %992 }
 0x280   : > { %v1179_v28 = vmul.f32 %v2633_v26, %v1177_v19  ;;  %v1174_v42 = vmul.f32 %v2631_v25, %v1172_v20  ;;  %v2756_v12 = vmul.f32 %v2732_v47, %v2649_v38  ;;  %v2760_v16 = vmul.f32 %v2732_v47, %v2646_v37 }
 0x281   : > { %v1129_v35 = vrot.slane %v2706_v23, 7  ;;  %v1124_v41 = vrot.slane %v2709_v24, 7  ;;  %v2770_v22 = vmul.f32 %v2667_v55, %v2732_v47 }
 0x282   : > { %v1181_v39 = vadd.f32 %v2715_v29, %v1179_v28  ;;  %v1175_v51 = vadd.f32 %v1174_v42, %v2638_v32  ;;  %v2775_v28 = vmul.f32 %v2664_v53, %v2732_v47 }
 0x283   : > { %v1131_v44 = vmul.f32 %v2656_v45, %v1129_v35  ;;  %v1126_v50 = vmul.f32 %v2652_v40, %v1124_v41 }
 0x284   : > { %v1235_v46 = vrot.slane %v1181_v39, 7  ;;  %v1230_v35 = vrot.slane %v1175_v51, 7 }
 0x285   : > { %v2738_v52 = vadd.f32 %v2730_v31, %v1131_v44  ;;  %v938_v58 = vpop.permute.xlu1 %937  ;;  %v2763_v18 = vadd.f32 %v1126_v50, %v2672_v57  ;;  %v2782_v44 = vmul.f32 %v1118_v14, %v2732_v47 }
 0x286   : > { %v1237_v63 = vmul.f32 %v2633_v26, %v1235_v46  ;;  %v2748_v9 = vmul.f32 %v938_v58, %v2615_v3  ;;  %v2751_v10 = vmul.f32 %v2617_v4, %v938_v58  ;;  %v1232_v53 = vmul.f32 %v2631_v25, %v1230_v35  ;;  %v2816_v43 = vpop.permute.xlu0 %966 }
 0x287   : > { %v1192_v11 = vrot.slane %v2738_v52, 7  ;;  %v1187_v37 = vrot.slane %v2763_v18, 7 }
 0x288   : > { %v1238_v54 = vadd.f32 %v1237_v63, %v2642_v34  ;;  %v964_v19 = vadd.f32 %v2751_v10, %v962_v60  ;;  %v961_v20 = vadd.f32 %v960_v49, %v2748_v9  ;;  %v2779_v34 = vmul.f32 %v1112_v15, %v2732_v47 }
 0x289   : > { %v1194_v38 = vmul.f32 %v2656_v45, %v1192_v11  ;;  %v1189_v49 = vmul.f32 %v2652_v40, %v1187_v37  ;;  %v2792_v63 = vmul.f32 %v2619_v5, %v938_v58  ;;  %v2795_v15 = vmul.f32 %v1181_v39, %v2732_v47 }
 0x28a   : > { %v1291_v41 = vrot.slane %v1238_v54, 7  ;;  %v1021_v42 = vrot.slane %v964_v19, 7  ;;  %v1016_v46 = vrot.slane %v961_v20, 7  ;;  %v2803_v37 = vadd.f32 %v1232_v53, %v2638_v32 }
 0x28b   : > { %v2785_v55 = vadd.f32 %v2745_v2, %v1194_v38  ;;  %v2800_v38 = vadd.f32 %v1189_v49, %v2672_v57  ;;  %v2813_v39 = vmul.f32 %v2623_v7, %v938_v58  ;;  %v971_v56 = vmul.f32 %v2816_v43, %v964_v19 }
 0x28c   : > { %v1293_v50 = vmul.f32 %v2633_v26, %v1291_v41  ;;  %v1023_v60 = vmul.f32 %v2717_v33, %v1021_v42  ;;  %v1018_v11 = vmul.f32 %v2703_v21, %v1016_v46  ;;  %v2810_v42 = vmul.f32 %v2621_v6, %v938_v58 }
 0x28d   : > { %v1249_v14 = vrot.slane %v2785_v55, 7  ;;  %v969_v58 = vmul.f32 %v2816_v43, %v961_v20  ;;  %v2842_v20 = vmul.f32 %v1238_v54, %v2732_v47 }
 0x28e   : > { %v2806_v35 = vadd.f32 %v1293_v50, %v2660_v48  ;;  %v1025_v41 = vadd.f32 %v2792_v63, %v1023_v60  ;;  %v943_v13 = vpop.permute.xlu1 %942  ;;  %v2825_v48 = vmul.f32 %v1175_v51, %v2732_v47 }
 0x28f   : > { %v1251_v46 = vmul.f32 %v2656_v45, %v1249_v14  ;;  %v2819_v49 = vmul.f32 %v943_v13, %v2615_v3  ;;  %v2822_v53 = vmul.f32 %v2617_v4, %v943_v13  ;;  %v1019_v4 = vadd.f32 %v1018_v11, %v2748_v9  ;;  %3231 = vst [vmem:[#allocation40_spill] sm:$0xff] %v2842_v20 }
 0x290   : > { %3227 = vst [vmem:[#allocation36_spill] sm:$0xff] %v2806_v35  ;;  %v1347_v50 = vrot.slane %v2806_v35, 7  ;;  %v1084_v60 = vrot.slane %v1025_v41, 7  ;;  %v2839_v35 = vmul.f32 %v2619_v5, %v943_v13  ;;  %v2856_v25 = vmul.f32 %v2623_v7, %v943_v13 }
 0x291   : > { %3228 = vst [vmem:[#allocation37_spill] sm:$0xff] %v2825_v48  ;;  %v2831_v14 = vadd.f32 %v1251_v46, %v2676_v59  ;;  %v977_v30 = vadd.f32 %v2822_v53, %v975_v61  ;;  %v974_v3 = vadd.f32 %v973_v62, %v2819_v49  ;;  %v2846_v46 = vmul.f32 %v2621_v6, %v943_v13 }
 0x292   : > { %v1349_v32 = vmul.f32 %v2633_v26, %v1347_v50  ;;  %v1086_v51 = vmul.f32 %v2717_v33, %v1084_v60  ;;  %3230 = vst [vmem:[#allocation39_spill] sm:$0xff] %v2839_v35  ;;  %v1079_v50 = vrot.slane %v1019_v4, 7  ;;  %v1244_v60 = vrot.slane %v2800_v38, 7 }
 0x293   : > { %3229 = vst [vmem:[#allocation38_spill] sm:$0xff] %v2831_v14  ;;  %v1305_v19 = vrot.slane %v2831_v14, 7  ;;  %v1036_v59 = vrot.slane %v977_v30, 7  ;;  %v1031_v61 = vrot.slane %v974_v3, 7 }
 0x294   : > { %v2849_v62 = vadd.f32 %v1349_v32, %v2689_v8  ;;  %v1088_v11 = vadd.f32 %v2810_v42, %v1086_v51  ;;  %v1028_v32 = vmul.f32 %v1025_v41, %v2816_v43  ;;  %v1081_v8 = vmul.f32 %v2703_v21, %v1079_v50 }
 0x295   : > { %v1307_v5 = vmul.f32 %v2656_v45, %v1305_v19  ;;  %v1038_v54 = vmul.f32 %v2720_v36, %v1036_v59  ;;  %v1033_v20 = vmul.f32 %v2711_v27, %v1031_v61  ;;  %v2870_v7 = vmul.f32 %v2652_v40, %v1244_v60 }
 0x296   : > { %3232 = vst [vmem:[#allocation41_spill] sm:$0xff] %v2849_v62  ;;  %v1403_v6 = vrot.slane %v2849_v62, 7  ;;  %v1147_v48 = vrot.slane %v1088_v11, 7  ;;  %v2880_v62 = vmul.f32 %v2803_v37, %v2732_v47  ;;  %v1286_v40 = vrot.slane %v2803_v37, 7  ;;  %v1499_v37 = vld [vmem:[%s3243_s26 + $0x30] sm:$0xff] }
 0x297   : > { %v2863_v51 = vadd.f32 %v1307_v5, %v2700_v17  ;;  %v1040_v14 = vadd.f32 %v2839_v35, %v1038_v54  ;;  %v2866_v19 = vpop.permute.xlu1 %979  ;;  %v1034_v59 = vadd.f32 %v1033_v20, %v2819_v49 }
 0x298   : > { %v1405_v13 = vmul.f32 %v2633_v26, %v1403_v6  ;;  %v1149_v61 = vmul.f32 %v2717_v33, %v1147_v48  ;;  %v982_v41 = vmul.f32 %v2866_v19, %v974_v3  ;;  %v984_v50 = vmul.f32 %v2866_v19, %v977_v30  ;;  %3234 = vst [vmem:[#allocation43_spill] sm:$0xff] %v2880_v62 }
 0x299   : > { %3233 = vst [vmem:[#allocation42_spill] sm:$0xff] %v2863_v51  ;;  %v1361_v17 = vrot.slane %v2863_v51, 7  ;;  %v1099_v5 = vrot.slane %v1040_v14, 7  ;;  %v1041_v54 = vmul.f32 %v1034_v59, %v2866_v19  ;;  %v1026_v6 = vmul.f32 %v1019_v4, %v2816_v43 }
 0x29a   : > { %v2883_v20 = vadd.f32 %v1405_v13, %v2715_v29  ;;  %v1151_v26 = vadd.f32 %v2813_v39, %v1149_v61  ;;  %v983_v60 = vadd.f32 %v982_v41, %v969_v58  ;;  %v985_v48 = vadd.f32 %v984_v50, %v971_v56 }
 0x29b   : > { %v1363_v3 = vmul.f32 %v2656_v45, %v1361_v17  ;;  %v1101_v30 = vmul.f32 %v2720_v36, %v1099_v5  ;;  %v1091_v29 = vmul.f32 %v1088_v11, %v2816_v43  ;;  %v1042_v58 = vadd.f32 %v1041_v54, %v1026_v6 }
 0x29c   : > { %v1207_v51 = vrot.slane %v1151_v26, 7  ;;  %v996_v35 = vadd.f32 %v2756_v12, %v983_v60  ;;  %v998_v62 = vadd.f32 %v2760_v16, %v985_v48  ;;  %v1043_v61 = vmul.f32 %v1040_v14, %v2866_v19 }
 0x29d   : > { %v2894_v13 = vadd.f32 %v1363_v3, %v2730_v31  ;;  %v1103_v56 = vadd.f32 %v2846_v46, %v1101_v30  ;;  %v1082_v4 = vadd.f32 %v1081_v8, %v2748_v9  ;;  %v1094_v50 = vrot.slane %v1034_v59, 7 }
 0x29e   : > { %v1209_v41 = vmul.f32 %v2717_v33, %v1207_v51  ;;  %v1154_v17 = vmul.f32 %v1151_v26, %v2816_v43  ;;  %v1044_v5 = vadd.f32 %v1043_v61, %v1028_v32  ;;  %v1057_v11 = vadd.f32 %v2770_v22, %v1042_v58 }
 0x29f   : > { %v1417_v12 = vrot.slane %v2894_v13, 7  ;;  %v1162_v16 = vrot.slane %v1103_v56, 7  ;;  %v1089_v54 = vmul.f32 %v1082_v4, %v2816_v43  ;;  %v1096_v14 = vmul.f32 %v2711_v27, %v1094_v50 }
 0x2a0   : > { %v1210_v31 = vadd.f32 %v1209_v41, %v2751_v10  ;;  %v2904_v60 = vpop.permute.xlu1 %1005  ;;  %v1106_v51 = vmul.f32 %v1103_v56, %v2866_v19  ;;  %v1059_v10 = vadd.f32 %v2775_v28, %v1044_v5  ;;  %v1142_v41 = vrot.slane %v1082_v4, 7 }
 0x2a1   : > { %v1419_v8 = vmul.f32 %v2656_v45, %v1417_v12  ;;  %v1164_v59 = vmul.f32 %v2720_v36, %v1162_v16  ;;  %v1008_v26 = vmul.f32 %v2904_v60, %v2685_v1  ;;  %v1010_v22 = vmul.f32 %v2904_v60, %v2682_v0 }
 0x2a2   : > { %v1263_v32 = vrot.slane %v1210_v31, 7  ;;  %v1071_v48 = vmul.f32 %v2709_v24, %v2904_v60  ;;  %v1073_v3 = vmul.f32 %v2706_v23, %v2904_v60  ;;  %v1097_v24 = vadd.f32 %v1096_v14, %v2819_v49 }
 0x2a3   : > { %v2921_v30 = vadd.f32 %v1419_v8, %v2745_v2  ;;  %v1166_v45 = vadd.f32 %v2856_v25, %v1164_v59  ;;  %v2924_v6 = vadd.f32 %v1008_v26, %v996_v35  ;;  %v2926_v1 = vadd.f32 %v1010_v22, %v998_v62 }
 0x2a4   : > { %v1265_v0 = vmul.f32 %v2717_v33, %v1263_v32  ;;  %v2929_v56 = vadd.f32 %v1071_v48, %v1057_v11  ;;  %v2931_v28 = vadd.f32 %v1073_v3, %v1059_v10  ;;  %v1107_v61 = vadd.f32 %v1106_v51, %v1091_v29 }
 0x2a5   : > { %v1221_v58 = vrot.slane %v1166_v45, 7  ;;  %v1134_v23 = vmul.f32 %v2763_v18, %v2904_v60  ;;  %v1136_v2 = vmul.f32 %v2738_v52, %v2904_v60  ;;  %v1104_v62 = vmul.f32 %v1097_v24, %v2866_v19 }
 0x2a6   : > { %v1266_v35 = vadd.f32 %v1265_v0, %v2792_v63  ;;  %v1157_v50 = vrot.slane %v1097_v24, 7  ;;  %v1122_v16 = vadd.f32 %v2782_v44, %v1107_v61  ;;  %v1169_v5 = vmul.f32 %v1166_v45, %v2866_v19  ;;  %v3235_v61 = vld [vmem:[#allocation39_spill] sm:$0xff] }
 0x2a7   : > { %v1223_v12 = vmul.f32 %v2720_v36, %v1221_v58  ;;  %v1197_v29 = vmul.f32 %v2800_v38, %v2904_v60  ;;  %v1105_v18 = vadd.f32 %v1104_v62, %v1089_v54  ;;  %v1144_v14 = vmul.f32 %v2703_v21, %v1142_v41  ;;  %v3236_v62 = vld [vmem:[#allocation38_spill] sm:$0xff] }
 0x2a8   : > { %v1319_v11 = vrot.slane %v1266_v35, 7  ;;  %v1159_v52 = vmul.f32 %v2711_v27, %v1157_v50  ;;  %v2948_v51 = vadd.f32 %v1136_v2, %v1122_v16  ;;  %v1170_v4 = vadd.f32 %v1169_v5, %v1154_v17  ;;  %v3238_v5 = vld [vmem:[#allocation40_spill] sm:$0xff] }
 0x2a9   : > { %v1224_v63 = vadd.f32 %v1223_v12, %v2822_v53  ;;  %v1199_v8 = vmul.f32 %v2785_v55, %v2904_v60  ;;  %v1120_v59 = vadd.f32 %v2779_v34, %v1105_v18  ;;  %v1145_v38 = vadd.f32 %v1144_v14, %v2748_v9  ;;  %v3237_v12 = vld [vmem:[#allocation37_spill] sm:$0xff] }
 0x2aa   : > { %v1321_v44 = vmul.f32 %v2717_v33, %v1319_v11  ;;  %v1160_v54 = vadd.f32 %v1159_v52, %v2819_v49  ;;  %v1185_v22 = vadd.f32 %v2795_v15, %v1170_v4  ;;  %v1213_v32 = vmul.f32 %v1210_v31, %v2816_v43 }
 0x2ab   : > { %v1277_v26 = vrot.slane %v1224_v63, 7  ;;  %v1227_v53 = vmul.f32 %v1224_v63, %v2866_v19  ;;  %v2960_v10 = vadd.f32 %v1134_v23, %v1120_v59  ;;  %v1152_v55 = vmul.f32 %v1145_v38, %v2816_v43 }
 0x2ac   : > { %v1322_v17 = vadd.f32 %v1321_v44, %v2810_v42  ;;  %v1167_v48 = vmul.f32 %v1160_v54, %v2866_v19  ;;  %v2965_v3 = vadd.f32 %v1199_v8, %v1185_v22  ;;  %v1202_v45 = vrot.slane %v1145_v38, 7 }
 0x2ad   : > { %v1279_v34 = vmul.f32 %v2720_v36, %v1277_v26  ;;  %v1216_v0 = vrot.slane %v1160_v54, 7  ;;  %v1228_v58 = vadd.f32 %v1227_v53, %v1213_v32  ;;  %v1247_v31 = vadd.f32 %v2870_v7, %v2672_v57 }
 0x2ae   : > { %v1375_v24 = vrot.slane %v1322_v17, 7  ;;  %v1168_v15 = vadd.f32 %v1167_v48, %v1152_v55  ;;  %v1204_v23 = vmul.f32 %v2703_v21, %v1202_v45  ;;  %v1255_v41 = vmul.f32 %v3236_v62, %v2904_v60  ;;  %v3245_v62 = vld [vmem:[#allocation33_spill] sm:$0xff] }
 0x2af   : > { %v1280_v42 = vadd.f32 %v1279_v34, %v3235_v61  ;;  %v1218_v2 = vmul.f32 %v2711_v27, %v1216_v0  ;;  %v1242_v11 = vadd.f32 %v3238_v5, %v1228_v58  ;;  %v1253_v18 = vmul.f32 %v1247_v31, %v2904_v60  ;;  %v3242_v61 = vld [vmem:[#allocation42_spill] sm:$0xff] }
 0x2b0   : > { %v1377_v50 = vmul.f32 %v2717_v33, %v1375_v24  ;;  %v1183_v16 = vadd.f32 %v3237_v12, %v1168_v15  ;;  %v1205_v7 = vadd.f32 %v1204_v23, %v2748_v9  ;;  %v1269_v63 = vmul.f32 %v1266_v35, %v2816_v43  ;;  %v3239_v35 = vld [vmem:[#allocation30_spill] sm:$0xff]  ;;  %v3241_v24 = vld [vmem:[#allocation32_spill] sm:$0xff]  ;;  %v3244_v23 = vld [vmem:[#allocation43_spill] sm:$0xff] }
 0x2b1   : > { %v1333_v14 = vrot.slane %v1280_v42, 7  ;;  %v1219_v52 = vadd.f32 %v1218_v2, %v2819_v49  ;;  %v2984_v44 = vadd.f32 %v1255_v41, %v1242_v11  ;;  %v1283_v33 = vmul.f32 %v1280_v42, %v2866_v19  ;;  %v1498_v11 = vld [vmem:[%s3243_s26 + $0x28] sm:$0xff] }
 0x2b2   : > { %v1378_v4 = vadd.f32 %v1377_v50, %v2813_v39  ;;  %v2982_v8 = vadd.f32 %v1197_v29, %v1183_v16  ;;  %v1211_v38 = vmul.f32 %v1205_v7, %v2816_v43  ;;  %v1258_v26 = vrot.slane %v1205_v7, 7  ;;  %v3240_v39 = vld [vmem:[#allocation36_spill] sm:$0xff] }
 0x2b3   : > { %v1335_v59 = vmul.f32 %v2720_v36, %v1333_v14  ;;  %v1225_v54 = vmul.f32 %v1219_v52, %v2866_v19  ;;  %v1272_v22 = vrot.slane %v1219_v52, 7  ;;  %v1284_v32 = vadd.f32 %v1283_v33, %v1269_v63 }
 0x2b4   : > { %v1288_v53 = vmul.f32 %v3239_v35, %v1286_v40  ;;  %v1297_v29 = vmul.f32 %v3240_v39, %v2732_v47  ;;  %v1260_v34 = vmul.f32 %v2703_v21, %v1258_v26  ;;  %v1300_v45 = vrot.slane %v1247_v31, 7  ;;  %v1500_v40 = vld [vmem:[%s3243_s26 + $0x38] sm:$0xff] }
 0x2b5   : > { %v1336_v55 = vadd.f32 %v1335_v59, %v2846_v46  ;;  %v1226_v48 = vadd.f32 %v1225_v54, %v1211_v38  ;;  %v1274_v0 = vmul.f32 %v2711_v27, %v1272_v22  ;;  %v1311_v42 = vmul.f32 %v3242_v61, %v2904_v60  ;;  %1512 = vmatpush.msra.mxu0 %v1500_v40  ;;  %v3246_v22 = vld [vmem:[#allocation41_spill] sm:$0xff]  ;;  %v1495_v40 = vld [vmem:[%s3243_s26 + $0x10] sm:$0xff] }
 0x2b6   : > { %v1289_v15 = vadd.f32 %v1288_v53, %v3241_v24  ;;  %v1298_v58 = vadd.f32 %v1297_v29, %v1284_v32  ;;  %v1261_v31 = vadd.f32 %v1260_v34, %v2748_v9  ;;  %v1302_v41 = vmul.f32 %v3245_v62, %v1300_v45 }
 0x2b7   : > { %v1389_v46 = vrot.slane %v1336_v55, 7  ;;  %v1240_v2 = vadd.f32 %v3244_v23, %v1226_v48  ;;  %v1275_v50 = vadd.f32 %v1274_v0, %v2819_v49  ;;  %v1325_v5 = vmul.f32 %v1322_v17, %v2816_v43  ;;  %1513 = vmatpush.msra.mxu0 %v1499_v37  ;;  %v1497_v17 = vld [vmem:[%s3243_s26 + $0x20] sm:$0xff]  ;;  %v1496_v48 = vld [vmem:[%s3243_s26 + $0x18] sm:$0xff]  ;;  %v3247_v23 = vld [vmem:[#allocation31_spill] sm:$0xff] }
 0x2b8   : > { %v1295_v12 = vmul.f32 %v1289_v15, %v2732_v47  ;;  %v3012_v16 = vadd.f32 %v1311_v42, %v1298_v58  ;;  %v1267_v52 = vmul.f32 %v1261_v31, %v2816_v43  ;;  %v1303_v63 = vadd.f32 %v1302_v41, %v2672_v57 }
 0x2b9   : > { %v1391_v14 = vmul.f32 %v2720_v36, %v1389_v46  ;;  %v3019_v7 = vadd.f32 %v1253_v18, %v1240_v2  ;;  %v1281_v33 = vmul.f32 %v1275_v50, %v2866_v19  ;;  %v1314_v59 = vrot.slane %v1261_v31, 7  ;;  %1514 = vmatpush.msra.mxu0 %v1498_v11 }
 0x2ba   : > { %v1328_v38 = vrot.slane %v1275_v50, 7  ;;  %v1339_v54 = vmul.f32 %v1336_v55, %v2866_v19  ;;  %v1309_v36 = vmul.f32 %v1303_v63, %v2904_v60  ;;  %v1342_v18 = vrot.slane %v1289_v15, 7 }
 0x2bb   : > { %v1392_v26 = vadd.f32 %v1391_v14, %v2856_v25  ;;  %v1353_v32 = vmul.f32 %v3246_v22, %v2732_v47  ;;  %v1282_v53 = vadd.f32 %v1281_v33, %v1267_v52  ;;  %v1316_v39 = vmul.f32 %v2703_v21, %v1314_v59  ;;  %1515 = vmatpush.msra.mxu0 %v1497_v17 }
 0x2bc   : > { %v1330_v29 = vmul.f32 %v2711_v27, %v1328_v38  ;;  %v1340_v55 = vadd.f32 %v1339_v54, %v1325_v5  ;;  %v1344_v25 = vmul.f32 %v3239_v35, %v1342_v18  ;;  %v1356_v34 = vrot.slane %v1303_v63, 7  ;;  %v1493_v38 = vld [vmem:[%s3243_s26] sm:$0xff] }
 0x2bd   : > { %v1367_v45 = vmul.f32 %v2894_v13, %v2904_v60  ;;  %v1381_v0 = vmul.f32 %v1378_v4, %v2816_v43  ;;  %v1296_v15 = vadd.f32 %v1295_v12, %v1282_v53  ;;  %v1317_v58 = vadd.f32 %v1316_v39, %v2748_v9  ;;  %1516 = vmatpush.msra.mxu0 %v1496_v48  ;;  %v1494_v12 = vld [vmem:[%s3243_s26 + $0x8] sm:$0xff] }
 0x2be   : > { %v1331_v61 = vadd.f32 %v1330_v29, %v2819_v49  ;;  %v1354_v42 = vadd.f32 %v1353_v32, %v1340_v55  ;;  %v1345_v37 = vadd.f32 %v1344_v25, %v3241_v24  ;;  %v1358_v46 = vmul.f32 %v3245_v62, %v1356_v34 }
 0x2bf   : > { %v1395_v13 = vmul.f32 %v1392_v26, %v2866_v19  ;;  %v1409_v4 = vmul.f32 %v2883_v20, %v2732_v47  ;;  %vm1481_vm2 = vweird.f32 %v3247_v23  ;;  %v1310_v2 = vadd.f32 %v1309_v36, %v1296_v15  ;;  %1517 = vmatpush.msra.mxu0 %v1495_v40 }
 0x2c0   : > { %v1323_v31 = vmul.f32 %v1317_v58, %v2816_v43  ;;  %v1337_v41 = vmul.f32 %v1331_v61, %v2866_v19  ;;  %v1368_v50 = vadd.f32 %v1367_v45, %v1354_v42  ;;  %v1351_v5 = vmul.f32 %v1345_v37, %v2732_v47 }
 0x2c1   : > { %v1359_v11 = vadd.f32 %v1358_v46, %v2672_v57  ;;  %v1370_v14 = vrot.slane %v1317_v58, 7  ;;  %v1384_v52 = vrot.slane %v1331_v61, 7  ;;  %v1396_v63 = vadd.f32 %v1395_v13, %v1381_v0  ;;  %1518 = vmatpush.msra.mxu0 %v1494_v12  ;;  %v3249_v0 = vld [vmem:[#allocation35_spill] sm:$0xff] }
 0x2c2   : > { %v1338_v20 = vadd.f32 %v1337_v41, %v1323_v31  ;;  %v1398_v33 = vrot.slane %v1345_v37, 7  ;;  %v1423_v59 = vmul.f32 %v2921_v30, %v2904_v60  ;;  %v1425_v30 = vsel %vm805_vm10, %v2924_v6, %v2929_v56  ;;  %v3248_v56 = vld [vmem:[#allocation34_spill] sm:$0xff] }
 0x2c3   : > { %v1365_v54 = vmul.f32 %v1359_v11, %v2904_v60  ;;  %v1372_v17 = vmul.f32 %v2703_v21, %v1370_v14  ;;  %v1386_v26 = vmul.f32 %v2711_v27, %v1384_v52  ;;  %v1412_v36 = vrot.slane %v1359_v11, 7  ;;  %1519 = vmatpush.msra.mxu0 %v1493_v38  ;;  %v3252_v11 = vld [vmem:[#allocation29_spill] sm:$0xff] }
 0x2c4   : > { %v1352_v18 = vadd.f32 %v1351_v5, %v1338_v20  ;;  %v1400_v22 = vmul.f32 %v3239_v35, %v1398_v33  ;;  %v1410_v32 = vadd.f32 %v1409_v4, %v1396_v63  ;;  %v1426_v21 = vsel %vm798_vm9, %v1425_v30, %v2960_v10  ;;  %v1469_v5 = vpop.permute.xlu2 %1468 }
 0x2c5   : > { %v1373_v53 = vadd.f32 %v1372_v17, %v2748_v9  ;;  %v1387_v39 = vadd.f32 %v1386_v26, %v2819_v49  ;;  %v1414_v29 = vmul.f32 %v3245_v62, %v1412_v36  ;;  %v1427_v35 = vsel %vm791_vm8, %v1426_v21, %v2982_v8 }
 0x2c6   : > { %v1366_v27 = vadd.f32 %v1365_v54, %v1352_v18  ;;  %v1401_v55 = vadd.f32 %v1400_v22, %v3241_v24  ;;  %v1424_v48 = vadd.f32 %v1423_v59, %v1410_v32  ;;  %v1429_v49 = vsel %vm1428_vm14, %v1427_v35, %v3019_v7 }
 0x2c7   : > { %v1379_v25 = vmul.f32 %v1373_v53, %v2816_v43  ;;  %v1393_v6 = vmul.f32 %v1387_v39, %v2866_v19  ;;  %v1415_v9 = vadd.f32 %v1414_v29, %v2672_v57  ;;  %vm1482_vm3 = vweird.f32 %v3248_v56 }
 0x2c8   : > { %v1487_v10 = vand.u32 2147483648, %v3247_v23  ;;  %v1431_v62 = vsel %vm1430_vm15, %v1429_v49, %v1310_v2  ;;  %v1437_v24 = vrot.slane %v1424_v48, 7  ;;  %v1407_v45 = vmul.f32 %v1401_v55, %v2732_v47  ;;  %vm3095_vm4 = vmor %vm1481_vm2, %vm1482_vm3 }
 0x2c9   : > { %v1394_v34 = vadd.f32 %v1393_v6, %v1379_v25  ;;  %v1433_v8 = vsel %vm1432_vm1, %v1431_v62, %v1366_v27  ;;  %v1440_v43 = vrot.slane %v1368_v50, 5  ;;  %v1480_v19 = vadd.f32 %v3248_v56, %v3249_v0 }
 0x2ca   : > { %v1485_v57 = vand.u32 2147483647, %v3247_v23  ;;  %v1443_v7 = vrot.slane %v3012_v16, 3  ;;  %v1421_v61 = vmul.f32 %v1415_v9, %v2904_v60  ;;  %v1446_v47 = vrot.slane %v2984_v44, 1 }
 0x2cb   : > { %v1408_v58 = vadd.f32 %v1407_v45, %v1394_v34  ;;  %v1460_v42 = vsel %vm805_vm10, %v1437_v24, %v1440_v43  ;;  %v1449_v40 = vrot.slane %v2965_v3, 7  ;;  %v1488_v46 = vor.u32 1.1754944e-38, %v1487_v10 }
 0x2cc   : > { %v1461_v37 = vsel %vm798_vm9, %v1460_v42, %v1443_v7  ;;  %v1452_v13 = vrot.slane %v2948_v51, 5  ;;  %v1484_v23 = vsel %vm3095_vm4, %v3248_v56, %v1480_v19  ;;  %vm1486_vm6 = vcmp.eq.f32.partialorder %v1485_v57, 8.507059e+37 }
 0x2cd   : > { %v1422_v16 = vadd.f32 %v1421_v61, %v1408_v58  ;;  %v1462_v4 = vsel %vm791_vm8, %v1461_v37, %v1446_v47  ;;  %v1455_v60 = vrot.slane %v2931_v28, 3  ;;  %v1458_v2 = vrot.slane %v2926_v1, 1 }
 0x2ce   : > { %v1463_v44 = vsel %vm1428_vm14, %v1462_v4, %v1449_v40  ;;  %v1489_v41 = vsel %vm1486_vm6, %v1488_v46, %v1484_v23 }
 0x2cf   : > { %v1435_v3 = vsel %vm1434_vm5, %v1433_v8, %v1422_v16  ;;  %v1464_v31 = vsel %vm1430_vm15, %v1463_v44, %v1452_v13  ;;  %v1491_v14 = vmul.f32 %v1489_v41, %v3252_v11 }
 0x2d0   : > { %v1465_v51 = vsel %vm1432_vm1, %v1464_v31, %v1455_v60 }
 0x2d1   : > { %v1466_v50 = vsel %vm1434_vm5, %v1465_v51, %v1458_v2 }
 0x2d2   : > { %v1467_v12 = vadd.f32 %v1466_v50, %v1435_v3 }
 0x2d4   : > { %v1471_v28 = vadd.f32 %v1469_v5, %v1467_v12 }
 0x2d6   : > { %v1492_v52 = vmul.f32 %v1491_v14, %v1471_v28 }
 0x2d8   : > { %1730 = vmatmul.msk.f32.vlgmr.msra.gmra.mxu0 %vm853_vm11, %v1492_v52 }
 0x355   : > { %v1521_v1 = vpop.f32.mrf.mxu0 }
 0x356   : > { %1524 = vst.msk [vmem:[%s653_s14] sm:$0xff] %vm658_vm0, %v1521_v1 }
 0x357   : > { %2210 = shalt.err (!%p2207_p10)
}
 0x358   : > { %1767 = dma.vmem_to_hbm [thread:$0]  (%p2470_p0), %s1539_s28, 128, %s1541_s11, %s1526_s7  }
 0x359 PF: > { %s3254_s13 = sld [smem:[#allocation26_spill]]  ;;  %s1552_s23 = sand.u32 1, %s2257_s18  }
 0x35a   : > { %s1553_s10 = scalar_lea.sflag [#allocation4], %s1552_s23 }
 0x35f   : > { %p3255_p12 = scmp.ge.s32.totalorder %s3254_s13, 2 }
 0x361   : > { %p1799_p4 = pnand %p3255_p12, %p2476_p6 }
 0x363   : > { %p1800_p11 = pneg %p1799_p4 }
 0x365   : > { %2252 = dma.done.wait (%p1800_p11), %s1553_s10, 128  }
 0x366   : > { %2254 = vsyncadd (%p1800_p11), %s1553_s10, 4294967168  ;;  %s3256_s21 = sld [smem:[#allocation27_spill]]  ;;  %s3259_s18 = smov %s2261_s19 }
 0x367   : > { %s3257_s8 = sld [smem:[#allocation25_spill]] }
 0x368   : > { %s3258_s20 = sld [smem:[#allocation28_spill]] }
 0x36c   : > { %p34_p2 = scmp.ge.s32.totalorder %s3256_s21, 4  }
 0x36d   : > { %s3260_s19 = smov %s3257_s8 }
 0x36e   :  { %36 = sbr.rel (!%p34_p2) target bundleno = 21 (0x15), region = 166 }
 0x373   :  { %1559 = vsyncpa [#allocation3], 1 }
 0x374   :  { %1561 = vsyncpa [#allocation3 + $0x1], 1 }
 0x375   :  { %1562 = vsyncpa [#allocation6], 1 }
 0x376   :  { %1564 = vsyncpa [#allocation6 + $0x1], 1 }
 0x377   :  { %1565 = vsyncpa [#allocation9], 1 }
 0x378   :  { %1566 = vsyncpa [#allocation12], 1 }
 0x379   :  { %1567 = vsyncpa [#allocation15], 1 }
 0x37a   :  { %1568 = vsyncpa [#allocation4], 1 }
 0x37b   :  { %1570 = vsyncpa [#allocation4 + $0x1], 1 }

</bundles_post_ra>
